<compile_context>
chip_gen: v6e
topology: v6e:2x2x1
jax: 0.10.0
libtpu: 0.0.40
codegen_flags: <defaults>
</compile_context>

<pallas_src>
import functools

import jax
import jax.numpy as jnp
from jax.experimental import pallas as pl
from jax.experimental.pallas import tpu as pltpu


# Fused-EMA buffer layout constants.
_LANE_W = 512                      # lane-dense width (multiple of 128)
_TILE_ROWS = 512                   # rows per EMA tile -> 1 MiB f32 per buffer
_CHUNK = _LANE_W * _TILE_ROWS      # fused buffer is padded to a multiple of this


def _round_up(x: int, m: int) -> int:
    return (x + m - 1) // m * m


# -----------------------------------------------------------------------------
# Pallas kernels
# -----------------------------------------------------------------------------
def _fused_ema_kernel(decay_ref, ema_ref, model_ref, out_ref):
    """out = d * ema + (1 - d) * model, elementwise; f32 accumulation (VPU)."""
    d = decay_ref[0]                                  # f32 scalar from SMEM
    e = ema_ref[...].astype(jnp.float32)
    m = model_ref[...].astype(jnp.float32)
    out_ref[...] = (d * e + (1.0 - d) * m).astype(out_ref.dtype)


def _linear_fwd_kernel(x_ref, w_ref, b_ref, o_ref, acc_ref):
    """Tiled o = x @ w + b with f32 accumulator scratch (MXU + VPU)."""
    @pl.when(pl.program_id(2) == 0)
    def _():
        acc_ref[...] = jnp.zeros_like(acc_ref)

    acc_ref[...] += jnp.dot(x_ref[...], w_ref[...],
                            preferred_element_type=jnp.float32)

    @pl.when(pl.program_id(2) == pl.num_programs(2) - 1)
    def _():
        o_ref[...] = (acc_ref[...] + b_ref[...]).astype(o_ref.dtype)


# -----------------------------------------------------------------------------
# Pallas wrappers
# -----------------------------------------------------------------------------
def _fused_ema_pallas(ema2d: jax.Array, model2d: jax.Array,
                      decay_arr: jax.Array) -> jax.Array:
    """One lane-dense EMA update over the whole fused parameter buffer."""
    rows = ema2d.shape[0]                             # multiple of _TILE_ROWS
    grid = (rows // _TILE_ROWS,)
    return pl.pallas_call(
        _fused_ema_kernel,
        out_shape=jax.ShapeDtypeStruct(ema2d.shape, ema2d.dtype),
        grid=grid,
        in_specs=[
            pl.BlockSpec((1,), lambda i: (0,),
                         memory_space=pltpu.MemorySpace.SMEM),   # decay scalar
            pl.BlockSpec((_TILE_ROWS, _LANE_W), lambda i: (i, 0)),  # ema
            pl.BlockSpec((_TILE_ROWS, _LANE_W), lambda i: (i, 0)),  # model
        ],
        out_specs=pl.BlockSpec((_TILE_ROWS, _LANE_W), lambda i: (i, 0)),
        input_output_aliases={1: 0},                  # EMA buffer updated in place
        compiler_params=pltpu.CompilerParams(
            dimension_semantics=("parallel",)),       # megacore / 2-TC sharding
    )(decay_arr, ema2d, model2d)


def _pack_arrays(w, b, hidden, hidden_pad, total):
    """Pack {w, b} into the fused, padded, lane-dense (rows, _LANE_W) buffer."""
    w = w.astype(jnp.float32)
    b = b.astype(jnp.float32)
    wp = jnp.pad(w, ((0, 0), (0, hidden_pad - hidden)))
    bp = jnp.pad(b, (0, hidden_pad - hidden))
    flat = jnp.concatenate([wp.reshape(-1), bp])
    flat = jnp.pad(flat, (0, total - flat.shape[0]))
    return flat.reshape(-1, _LANE_W)


@functools.partial(jax.jit, donate_argnums=(0,),
                   static_argnames=("hidden", "hidden_pad", "total"))
def _ema_update_step(ema2d, w, b, decay_arr, *, hidden, hidden_pad, total):
    """Pack the live-model params and run the fused in-place EMA update."""
    model2d = _pack_arrays(w, b, hidden, hidden_pad, total)
    return _fused_ema_pallas(ema2d, model2d, decay_arr)


def pallas_linear_forward(x2d: jax.Array, w_pad: jax.Array,
                          b_pad: jax.Array) -> jax.Array:
    """x2d: (B, F), w_pad: (F, Hp), b_pad: (Hp,) -> (Mp, Hp) with Mp = pad(B, 8)."""
    B, F = x2d.shape
    Hp = w_pad.shape[1]                               # multiple of 128 by setup

    tm = 128 if B > 128 else _round_up(max(B, 1), 8)
    Mp = _round_up(B, tm)
    if Mp != B:
        x2d = jnp.pad(x2d, ((0, Mp - B), (0, 0)))     # zero rows -> zero outputs

    tn = 256 if Hp % 256 == 0 else (128 if Hp % 128 == 0 else Hp)
    tk = 256 if F % 256 == 0 else (128 if F % 128 == 0 else F)
    grid = (Mp // tm, Hp // tn, F // tk)

    b2 = b_pad.reshape(1, Hp)
    return pl.pallas_call(
        _linear_fwd_kernel,
        out_shape=jax.ShapeDtypeStruct((Mp, Hp), x2d.dtype),
        grid=grid,
        in_specs=[
            pl.BlockSpec((tm, tk), lambda i, j, k: (i, k)),
            pl.BlockSpec((tk, tn), lambda i, j, k: (k, j)),
            pl.BlockSpec((1, tn), lambda i, j, k: (0, j)),
        ],
        out_specs=pl.BlockSpec((tm, tn), lambda i, j, k: (i, j)),
        scratch_shapes=[pltpu.VMEM((tm, tn), jnp.float32)],
        compiler_params=pltpu.CompilerParams(
            dimension_semantics=("parallel", "parallel", "arbitrary")),
    )(x2d, w_pad, b2)


# -----------------------------------------------------------------------------
# ModelEma equivalent
# -----------------------------------------------------------------------------
class ModelEmaPallas:
    """JAX/Pallas equivalent of ModelEma for a synthetic linear inner module.

    All EMA parameters are stored in one fused, lane-dense, zero-padded f32
    buffer (padded once at construction), so update() is a single in-place
    Pallas call regardless of how many parameter tensors the model has.
    """

    def __init__(self, model_params: dict, decay: float = 0.9997):
        w = jnp.asarray(model_params["w"], dtype=jnp.float32)
        b = jnp.asarray(model_params["b"], dtype=jnp.float32)
        self._feat, self._hidden = w.shape
        self._hidden_pad = _round_up(self._hidden, 128)     # lane-dense W/b
        n = self._feat * self._hidden_pad + self._hidden_pad
        self._total = _round_up(n, _CHUNK)
        self.decay = float(decay)
        # deepcopy(model) equivalent: own packed copy of the state dict.
        self._flat = _pack_arrays(w, b, self._hidden, self._hidden_pad,
                                  self._total)

    # ---- EMA state access (original, unpadded shapes) ----
    def state_dict(self) -> dict:
        flat = self._flat.reshape(-1)
        nw = self._feat * self._hidden_pad
        w = flat[:nw].reshape(self._feat, self._hidden_pad)[:, : self._hidden]
        b = flat[nw: nw + self._hidden_pad][: self._hidden]
        return {"w": w, "b": b}

    def _unpack_padded(self):
        flat = self._flat.reshape(-1)
        nw = self._feat * self._hidden_pad
        w_pad = flat[:nw].reshape(self._feat, self._hidden_pad)
        b_pad = flat[nw: nw + self._hidden_pad]
        return w_pad, b_pad

    # ---- EMA maintenance ----
    def update(self, model_params: dict):
        decay_arr = jnp.asarray([self.decay], dtype=jnp.float32)
        self._flat = _ema_update_step(
            self._flat,
            jnp.asarray(model_params["w"], dtype=jnp.float32),
            jnp.asarray(model_params["b"], dtype=jnp.float32),
            decay_arr,
            hidden=self._hidden, hidden_pad=self._hidden_pad,
            total=self._total)

    def set(self, model_params: dict):
        self._flat = _pack_arrays(
            jnp.asarray(model_params["w"], dtype=jnp.float32),
            jnp.asarray(model_params["b"], dtype=jnp.float32),
            self._hidden, self._hidden_pad, self._total)

    # ---- forward (delegates to the EMA-copied inner module) ----
    def forward(self, image: jax.Array, text=None):
        # TODO(synk): `text` branch / forward hooks depend on the unspecified
        # inner module; unused for the synthetic linear module.
        B = image.shape[0]
        x2d = image.reshape(B, -1).astype(jnp.float32)
        w_pad, b_pad = self._unpack_padded()
        out = pallas_linear_forward(x2d, w_pad, b_pad)
        return out[:B, : self._hidden]

    __call__ = forward


# -----------------------------------------------------------------------------
# Demo / self-test
# -----------------------------------------------------------------------------
if __name__ == "__main__":
    key = jax.random.PRNGKey(0)
    k_img, k_w, k_b, k_dw, k_db = jax.random.split(key, 5)

    B, C, H, W = 2, 4, 16, 16
    feat = C * H * W          # 1024
    hidden = 32
    decay = 0.9997

    image = jax.random.normal(k_img, (B, C, H, W), dtype=jnp.float32)

    # deterministic synthetic inner-model parameters
    model_params = {
        "w": jax.random.normal(k_w, (feat, hidden), dtype=jnp.float32) * 0.02,
        "b": jax.random.normal(k_b, (hidden,), dtype=jnp.float32) * 0.02,
    }

    ema = ModelEmaPallas(model_params, decay=decay)

    # simulate two training steps changing the live model, EMA-update each time
    step1 = {
        "w": model_params["w"] + 0.1 * jax.random.normal(k_dw, (feat, hidden)),
        "b": model_params["b"] + 0.1 * jax.random.normal(k_db, (hidden,)),
    }
    step2 = {"w": step1["w"] * 1.01 + 0.003, "b": step1["b"] * 0.99 - 0.001}

    ref_w, ref_b = model_params["w"], model_params["b"]
    for p in (step1, step2):
        ema.update(p)
        ref_w = decay * ref_w + (1.0 - decay) * p["w"]
        ref_b = decay * ref_b + (1.0 - decay) * p["b"]

    sd = ema.state_dict()
    assert jnp.allclose(sd["w"], ref_w, atol=1e-5, rtol=1e-5)
    assert jnp.allclose(sd["b"], ref_b, atol=1e-5, rtol=1e-5)

    # forward through the EMA module (tiled Pallas matmul, padded lane-dense)
    out = ema(image)
    out = jax.block_until_ready(out)
    ref_out = image.reshape(B, -1) @ ref_w + ref_b
    assert out.shape == (B, hidden)
    assert jnp.allclose(out, ref_out, atol=1e-4, rtol=1e-4)

    # set() copies the live model params into the EMA buffer
    ema.set(step2)
    sd2 = ema.state_dict()
    assert jnp.allclose(sd2["w"], step2["w"], atol=1e-6, rtol=1e-6)
    assert jnp.allclose(sd2["b"], step2["b"], atol=1e-6, rtol=1e-6)

    print("KERNEL_OK")
</pallas_src>

<mosaic_0001>
module attributes {stable_mosaic.version = 11 : i64} {
  func.func @_fused_ema_kernel(%arg0: i32, %arg1: memref<1xf32, #tpu.memory_space<smem>>, %arg2: memref<512x512xf32, #tpu.memory_space<vmem>>, %arg3: memref<512x512xf32, #tpu.memory_space<vmem>>, %arg4: memref<512x512xf32, #tpu.memory_space<vmem>>) attributes {dimension_semantics = [#tpu.dimension_semantics<parallel>], iteration_bounds = array<i64: 1>, scalar_prefetch = 0 : i64, scratch_operands = 0 : i64, tpu.core_type = #tpu.core_type<tc>, window_params = [{transform_indices = @transform_0, window_bounds = array<i64: 1>}, {transform_indices = @transform_1, window_bounds = array<i64: 512, 512>}, {transform_indices = @transform_2, window_bounds = array<i64: 512, 512>}, {transform_indices = @transform_3, window_bounds = array<i64: 512, 512>}]} {
    %c0 = arith.constant 0 : index
    %0 = memref.load %arg1[%c0] : memref<1xf32, #tpu.memory_space<smem>>
    %c0_0 = arith.constant 0 : index
    %c0_1 = arith.constant 0 : index
    %1 = vector.load %arg2[%c0_0, %c0_1] : memref<512x512xf32, #tpu.memory_space<vmem>>, vector<512x512xf32>
    %c0_2 = arith.constant 0 : index
    %c0_3 = arith.constant 0 : index
    %2 = vector.load %arg3[%c0_2, %c0_3] : memref<512x512xf32, #tpu.memory_space<vmem>>, vector<512x512xf32>
    %3 = vector.broadcast %0 : f32 to vector<512x512xf32>
    %4 = arith.mulf %3, %1 : vector<512x512xf32>
    %cst = arith.constant 1.000000e+00 : f32
    %5 = arith.subf %cst, %0 : f32
    %6 = vector.broadcast %5 : f32 to vector<512x512xf32>
    %7 = arith.mulf %6, %2 : vector<512x512xf32>
    %8 = arith.addf %4, %7 : vector<512x512xf32>
    %c0_4 = arith.constant 0 : index
    %c0_5 = arith.constant 0 : index
    %9 = vector.load %arg4[%c0_4, %c0_5] : memref<512x512xf32, #tpu.memory_space<vmem>>, vector<512x512xf32>
    tpu.vector_store %arg4[%c0_4, %c0_5], %8 {strides = array<i32>} : memref<512x512xf32, #tpu.memory_space<vmem>>, vector<512x512xf32>,
    return
  }
  func.func @transform_0(%arg0: i32) -> i32 {
    %c0_i32 = arith.constant 0 : i32
    %c0_i32_0 = arith.constant 0 : i32
    return %c0_i32 : i32
  }
  func.func @transform_1(%arg0: i32) -> (i32, i32) {
    %c0_i32 = arith.constant 0 : i32
    %c0_i32_0 = arith.constant 0 : i32
    return %arg0, %c0_i32 : i32, i32
  }
  func.func @transform_2(%arg0: i32) -> (i32, i32) {
    %c0_i32 = arith.constant 0 : i32
    %c0_i32_0 = arith.constant 0 : i32
    return %arg0, %c0_i32 : i32, i32
  }
  func.func @transform_3(%arg0: i32) -> (i32, i32) {
    %c0_i32 = arith.constant 0 : i32
    %c0_i32_0 = arith.constant 0 : i32
    return %arg0, %c0_i32 : i32, i32
  }
}

</mosaic_0001>

<bundles_post_ra>
// kernel: _ema_update_step.1
= control target key start
LH: loop header
LB: loop body
LE: loop exit
PB: predicated region body
PF: predicated region fallthrough
CT: control target
= control target key end

     0   :  { %9 = vsyncpa [#allocation4], 0  ;;  %s2961_s0 = inlined_call_operand.<no memory space> [shape: f32[1], index: 0, kind: input, shape index: {}]   ;;  %s2962_s1 = inlined_call_operand.hbm [shape: f32[512,512], index: 1, kind: input, shape index: {}, may-alias: {1,3}]   ;;  %s2963_s2 = inlined_call_operand.vmem [shape: f32[512,512], index: 2, kind: input, shape index: {}]   ;;  %s2964_s3 = inlined_call_operand.hbm [shape: f32[512,512], index: 3, kind: output, shape index: {}, may-alias: {1,3}]  }
   0x1   :  { %10 = vsyncpa [#allocation5], 0  ;;  %s1635_s12 = smov [#allocation3]  }
   0x2   :  { %s18_s13 = sshll.u32 %s1635_s12, 4  ;;  %s19_s13 = int_to_ptr.vmem [resolvable:$true] %s18_s13 }
   0x3   :  { %s1599_s14 = scalar_lea.vmem %s19_s13, 32768  ;;  %p1604_p1 = scmp.lt.s32.totalorder %s19_s13, %s19_s13 }
   0x4   :  { %p1600_p0 = scmp.ne.s32.totalorder %s19_s13, %s1599_s14  ;;  %p1605_p2 = scmp.lt.s32.totalorder %s1599_s14, %s1599_s14 }
   0x6   :  { %p1606_p3 = por %p1605_p2, %p1604_p1 }
   0x8   :  { %p1607_p4 = pnand %p1606_p3, %p1600_p0 }
   0xa   :  { %1610 = shalt.err (!%p1607_p4)
}
   0xb   :  { %s1636_s15 = smov 512   ;;  %s1637_s16 = smov 32  }
   0xc   :  { %24 = dma.hbm_to_vmem [thread:$0]  %s2962_s1, 32768, %s19_s13, [#allocation4], %s1636_s15, %s1636_s15, %s1637_s16  }
   0xd   :  { %1631 = dma.done.wait [#allocation4], 32768  }
   0xe   :  { %1632 = vsyncadd [#allocation4], 4294934528  ;;  %s800_s21 = ssub.f32 1.0, %s2961_s0  ;;  %v1671_v0 = vstv %s2961_s0  ;;  %v31_v2 = vld [vmem:[#allocation3] sm:$0xff]  ;;  %v32_v4 = vld [vmem:[#allocation3 + $0x8] sm:$0xff]  ;;  %s1638_s23 = smov [#allocation6]  }
   0xf   :  { %v287_v3 = vld [vmem:[%s2963_s2] sm:$0xff]  ;;  %v544_v5 = vmul.f32 %v1671_v0, %v31_v2  ;;  %v288_v7 = vld [vmem:[%s2963_s2 + $0x8] sm:$0xff]  ;;  %v545_v8 = vmul.f32 %v1671_v0, %v32_v4  ;;  %v33_v9 = vld [vmem:[#allocation3 + $0x10] sm:$0xff]  ;;  %s1575_s24 = sshll.u32 %s1638_s23, 4  ;;  %s1576_s24 = int_to_ptr.vmem [resolvable:$true] %s1575_s24 }
  0x10   :  { %v1673_v1 = vstv %s800_s21  ;;  %v289_v10 = vld [vmem:[%s2963_s2 + $0x10] sm:$0xff]  ;;  %v546_v12 = vmul.f32 %v1671_v0, %v33_v9  ;;  %v34_v14 = vld [vmem:[#allocation3 + $0x18] sm:$0xff]  ;;  %v35_v16 = vld [vmem:[#allocation3 + $0x20] sm:$0xff]  ;;  %p1616_p6 = scmp.lt.s32.totalorder %s1576_s24, %s1576_s24 }
  0x11   :  { %v802_v6 = vmul.f32 %v1673_v1, %v287_v3  ;;  %v803_v11 = vmul.f32 %v1673_v1, %v288_v7  ;;  %v804_v13 = vmul.f32 %v1673_v1, %v289_v10  ;;  %v290_v15 = vld [vmem:[%s2963_s2 + $0x18] sm:$0xff]  ;;  %v547_v18 = vmul.f32 %v1671_v0, %v34_v14  ;;  %v291_v20 = vld [vmem:[%s2963_s2 + $0x20] sm:$0xff]  ;;  %v36_v22 = vld [vmem:[#allocation3 + $0x28] sm:$0xff] }
  0x12   :  { %v805_v19 = vmul.f32 %v1673_v1, %v290_v15  ;;  %v548_v21 = vmul.f32 %v1671_v0, %v35_v16  ;;  %v292_v23 = vld [vmem:[%s2963_s2 + $0x28] sm:$0xff]  ;;  %v806_v26 = vmul.f32 %v1673_v1, %v291_v20  ;;  %v549_v27 = vmul.f32 %v1671_v0, %v36_v22  ;;  %v37_v28 = vld [vmem:[#allocation3 + $0x30] sm:$0xff]  ;;  %v38_v30 = vld [vmem:[#allocation3 + $0x38] sm:$0xff] }
  0x13   :  { %v1058_v17 = vadd.f32 %v802_v6, %v544_v5  ;;  %v1059_v24 = vadd.f32 %v803_v11, %v545_v8  ;;  %v1060_v25 = vadd.f32 %v804_v13, %v546_v12  ;;  %v293_v29 = vld [vmem:[%s2963_s2 + $0x30] sm:$0xff]  ;;  %v807_v32 = vmul.f32 %v1673_v1, %v292_v23  ;;  %v294_v35 = vld [vmem:[%s2963_s2 + $0x38] sm:$0xff]  ;;  %v39_v36 = vld [vmem:[#allocation3 + $0x40] sm:$0xff] }
  0x14   :  { %v1061_v31 = vadd.f32 %v805_v19, %v547_v18  ;;  %v550_v33 = vmul.f32 %v1671_v0, %v37_v28  ;;  %v808_v34 = vmul.f32 %v1673_v1, %v293_v29  ;;  %v295_v37 = vld [vmem:[%s2963_s2 + $0x40] sm:$0xff]  ;;  %v1062_v38 = vadd.f32 %v806_v26, %v548_v21  ;;  %v40_v42 = vld [vmem:[#allocation3 + $0x48] sm:$0xff]  ;;  %v41_v44 = vld [vmem:[#allocation3 + $0x50] sm:$0xff] }
  0x15   :  { %1314 = vst [vmem:[#allocation6] sm:$0xff] %v1058_v17  ;;  %1315 = vst [vmem:[#allocation6 + $0x8] sm:$0xff] %v1059_v24  ;;  %v551_v39 = vmul.f32 %v1671_v0, %v38_v30  ;;  %v809_v40 = vmul.f32 %v1673_v1, %v294_v35  ;;  %v552_v41 = vmul.f32 %v1671_v0, %v39_v36  ;;  %v296_v43 = vld [vmem:[%s2963_s2 + $0x48] sm:$0xff]  ;;  %v297_v49 = vld [vmem:[%s2963_s2 + $0x50] sm:$0xff] }
  0x16   :  { %1316 = vst [vmem:[#allocation6 + $0x10] sm:$0xff] %v1060_v25  ;;  %1317 = vst [vmem:[#allocation6 + $0x18] sm:$0xff] %v1061_v31  ;;  %v1063_v45 = vadd.f32 %v807_v32, %v549_v27  ;;  %v1064_v46 = vadd.f32 %v808_v34, %v550_v33  ;;  %v810_v47 = vmul.f32 %v1673_v1, %v295_v37  ;;  %v42_v50 = vld [vmem:[#allocation3 + $0x58] sm:$0xff]  ;;  %v43_v56 = vld [vmem:[#allocation3 + $0x60] sm:$0xff] }
  0x17   :  { %v553_v48 = vmul.f32 %v1671_v0, %v40_v42  ;;  %v298_v51 = vld [vmem:[%s2963_s2 + $0x58] sm:$0xff]  ;;  %1318 = vst [vmem:[#allocation6 + $0x20] sm:$0xff] %v1062_v38  ;;  %v1065_v52 = vadd.f32 %v809_v40, %v551_v39  ;;  %v811_v53 = vmul.f32 %v1673_v1, %v296_v43  ;;  %v554_v54 = vmul.f32 %v1671_v0, %v41_v44  ;;  %v299_v57 = vld [vmem:[%s2963_s2 + $0x60] sm:$0xff]  ;;  %v44_v58 = vld [vmem:[#allocation3 + $0x68] sm:$0xff] }
  0x18   :  { %v812_v55 = vmul.f32 %v1673_v1, %v297_v49  ;;  %1319 = vst [vmem:[#allocation6 + $0x28] sm:$0xff] %v1063_v45  ;;  %1320 = vst [vmem:[#allocation6 + $0x30] sm:$0xff] %v1064_v46  ;;  %v1066_v59 = vadd.f32 %v810_v47, %v552_v41  ;;  %v555_v60 = vmul.f32 %v1671_v0, %v42_v50  ;;  %v300_v63 = vld [vmem:[%s2963_s2 + $0x68] sm:$0xff]  ;;  %v45_v2 = vld [vmem:[#allocation3 + $0x70] sm:$0xff] }
  0x19   :  { %v813_v61 = vmul.f32 %v1673_v1, %v298_v51  ;;  %v556_v62 = vmul.f32 %v1671_v0, %v43_v56  ;;  %v301_v3 = vld [vmem:[%s2963_s2 + $0x70] sm:$0xff]  ;;  %1321 = vst [vmem:[#allocation6 + $0x38] sm:$0xff] %v1065_v52  ;;  %v1067_v4 = vadd.f32 %v811_v53, %v553_v48  ;;  %v814_v6 = vmul.f32 %v1673_v1, %v299_v57  ;;  %v46_v8 = vld [vmem:[#allocation3 + $0x78] sm:$0xff]  ;;  %v47_v10 = vld [vmem:[#allocation3 + $0x80] sm:$0xff] }
  0x1a   :  { %v1068_v5 = vadd.f32 %v812_v55, %v554_v54  ;;  %v557_v7 = vmul.f32 %v1671_v0, %v44_v58  ;;  %v302_v9 = vld [vmem:[%s2963_s2 + $0x78] sm:$0xff]  ;;  %1322 = vst [vmem:[#allocation6 + $0x40] sm:$0xff] %v1066_v59  ;;  %v815_v12 = vmul.f32 %v1673_v1, %v300_v63  ;;  %v558_v13 = vmul.f32 %v1671_v0, %v45_v2  ;;  %v303_v15 = vld [vmem:[%s2963_s2 + $0x80] sm:$0xff]  ;;  %v48_v16 = vld [vmem:[#allocation3 + $0x88] sm:$0xff] }
  0x1b   :  { %v1069_v11 = vadd.f32 %v813_v61, %v555_v60  ;;  %v816_v14 = vmul.f32 %v1673_v1, %v301_v3  ;;  %v304_v17 = vld [vmem:[%s2963_s2 + $0x88] sm:$0xff]  ;;  %1323 = vst [vmem:[#allocation6 + $0x48] sm:$0xff] %v1067_v4  ;;  %v1070_v18 = vadd.f32 %v814_v6, %v556_v62  ;;  %v559_v19 = vmul.f32 %v1671_v0, %v46_v8  ;;  %v49_v22 = vld [vmem:[#allocation3 + $0x90] sm:$0xff]  ;;  %v50_v24 = vld [vmem:[#allocation3 + $0x98] sm:$0xff] }
  0x1c   :  { %1324 = vst [vmem:[#allocation6 + $0x50] sm:$0xff] %v1068_v5  ;;  %v817_v20 = vmul.f32 %v1673_v1, %v302_v9  ;;  %v560_v21 = vmul.f32 %v1671_v0, %v47_v10  ;;  %v305_v23 = vld [vmem:[%s2963_s2 + $0x90] sm:$0xff]  ;;  %v1071_v25 = vadd.f32 %v815_v12, %v557_v7  ;;  %v818_v27 = vmul.f32 %v1673_v1, %v303_v15  ;;  %v306_v29 = vld [vmem:[%s2963_s2 + $0x98] sm:$0xff]  ;;  %v51_v30 = vld [vmem:[#allocation3 + $0xa0] sm:$0xff] }
  0x1d   :  { %1325 = vst [vmem:[#allocation6 + $0x58] sm:$0xff] %v1069_v11  ;;  %v1072_v26 = vadd.f32 %v816_v14, %v558_v13  ;;  %v561_v28 = vmul.f32 %v1671_v0, %v48_v16  ;;  %v307_v31 = vld [vmem:[%s2963_s2 + $0xa0] sm:$0xff]  ;;  %1326 = vst [vmem:[#allocation6 + $0x60] sm:$0xff] %v1070_v18  ;;  %v819_v33 = vmul.f32 %v1673_v1, %v304_v17  ;;  %v52_v36 = vld [vmem:[#allocation3 + $0xa8] sm:$0xff] }
  0x1e   :  { %v1073_v32 = vadd.f32 %v817_v20, %v559_v19  ;;  %v562_v34 = vmul.f32 %v1671_v0, %v49_v22  ;;  %v820_v35 = vmul.f32 %v1673_v1, %v305_v23  ;;  %v308_v37 = vld [vmem:[%s2963_s2 + $0xa8] sm:$0xff]  ;;  %v53_v38 = vld [vmem:[#allocation3 + $0xb0] sm:$0xff]  ;;  %1327 = vst [vmem:[#allocation6 + $0x68] sm:$0xff] %v1071_v25  ;;  %v1074_v39 = vadd.f32 %v818_v27, %v560_v21  ;;  %v54_v44 = vld [vmem:[#allocation3 + $0xb8] sm:$0xff] }
  0x1f   :  { %1328 = vst [vmem:[#allocation6 + $0x70] sm:$0xff] %v1072_v26  ;;  %v563_v40 = vmul.f32 %v1671_v0, %v50_v24  ;;  %v821_v41 = vmul.f32 %v1673_v1, %v306_v29  ;;  %v564_v42 = vmul.f32 %v1671_v0, %v51_v30  ;;  %v309_v43 = vld [vmem:[%s2963_s2 + $0xb0] sm:$0xff]  ;;  %v310_v45 = vld [vmem:[%s2963_s2 + $0xb8] sm:$0xff]  ;;  %v1075_v46 = vadd.f32 %v819_v33, %v561_v28  ;;  %v55_v50 = vld [vmem:[#allocation3 + $0xc0] sm:$0xff] }
  0x20   :  { %1329 = vst [vmem:[#allocation6 + $0x78] sm:$0xff] %v1073_v32  ;;  %v1076_v47 = vadd.f32 %v820_v35, %v562_v34  ;;  %v822_v48 = vmul.f32 %v1673_v1, %v307_v31  ;;  %v565_v49 = vmul.f32 %v1671_v0, %v52_v36  ;;  %v311_v51 = vld [vmem:[%s2963_s2 + $0xc0] sm:$0xff]  ;;  %v56_v52 = vld [vmem:[#allocation3 + $0xc8] sm:$0xff]  ;;  %1330 = vst [vmem:[#allocation6 + $0x80] sm:$0xff] %v1074_v39 }
  0x21   :  { %v1077_v53 = vadd.f32 %v821_v41, %v563_v40  ;;  %v823_v54 = vmul.f32 %v1673_v1, %v308_v37  ;;  %v566_v55 = vmul.f32 %v1671_v0, %v53_v38  ;;  %v824_v56 = vmul.f32 %v1673_v1, %v309_v43  ;;  %v312_v57 = vld [vmem:[%s2963_s2 + $0xc8] sm:$0xff]  ;;  %v57_v58 = vld [vmem:[#allocation3 + $0xd0] sm:$0xff]  ;;  %1331 = vst [vmem:[#allocation6 + $0x88] sm:$0xff] %v1075_v46  ;;  %v58_v2 = vld [vmem:[#allocation3 + $0xd8] sm:$0xff] }
  0x22   :  { %v313_v59 = vld [vmem:[%s2963_s2 + $0xd0] sm:$0xff]  ;;  %1332 = vst [vmem:[#allocation6 + $0x90] sm:$0xff] %v1076_v47  ;;  %v1078_v60 = vadd.f32 %v822_v48, %v564_v42  ;;  %v567_v61 = vmul.f32 %v1671_v0, %v54_v44  ;;  %v825_v62 = vmul.f32 %v1673_v1, %v310_v45  ;;  %v568_v63 = vmul.f32 %v1671_v0, %v55_v50  ;;  %v314_v3 = vld [vmem:[%s2963_s2 + $0xd8] sm:$0xff]  ;;  %v59_v4 = vld [vmem:[#allocation3 + $0xe0] sm:$0xff] }
  0x23   :  { %1333 = vst [vmem:[#allocation6 + $0x98] sm:$0xff] %v1077_v53  ;;  %v1079_v5 = vadd.f32 %v823_v54, %v565_v49  ;;  %v1080_v6 = vadd.f32 %v824_v56, %v566_v55  ;;  %v826_v7 = vmul.f32 %v1673_v1, %v311_v51  ;;  %v569_v8 = vmul.f32 %v1671_v0, %v56_v52  ;;  %v315_v9 = vld [vmem:[%s2963_s2 + $0xe0] sm:$0xff]  ;;  %v60_v10 = vld [vmem:[#allocation3 + $0xe8] sm:$0xff]  ;;  %v61_v16 = vld [vmem:[#allocation3 + $0xf0] sm:$0xff] }
  0x24   :  { %1334 = vst [vmem:[#allocation6 + $0xa0] sm:$0xff] %v1078_v60  ;;  %v1081_v11 = vadd.f32 %v825_v62, %v567_v61  ;;  %v827_v12 = vmul.f32 %v1673_v1, %v312_v57  ;;  %v570_v13 = vmul.f32 %v1671_v0, %v57_v58  ;;  %v828_v14 = vmul.f32 %v1673_v1, %v313_v59  ;;  %v316_v15 = vld [vmem:[%s2963_s2 + $0xe8] sm:$0xff]  ;;  %v317_v17 = vld [vmem:[%s2963_s2 + $0xf0] sm:$0xff]  ;;  %v62_v22 = vld [vmem:[#allocation3 + $0xf8] sm:$0xff] }
  0x25   :  { %1335 = vst [vmem:[#allocation6 + $0xa8] sm:$0xff] %v1079_v5  ;;  %1336 = vst [vmem:[#allocation6 + $0xb0] sm:$0xff] %v1080_v6  ;;  %v1082_v18 = vadd.f32 %v826_v7, %v568_v63  ;;  %v571_v19 = vmul.f32 %v1671_v0, %v58_v2  ;;  %v829_v20 = vmul.f32 %v1673_v1, %v314_v3  ;;  %v318_v23 = vld [vmem:[%s2963_s2 + $0xf8] sm:$0xff]  ;;  %v63_v24 = vld [vmem:[#allocation3 + $0x100] sm:$0xff] }
  0x26   :  { %v572_v21 = vmul.f32 %v1671_v0, %v59_v4  ;;  %1337 = vst [vmem:[#allocation6 + $0xb8] sm:$0xff] %v1081_v11  ;;  %v1083_v25 = vadd.f32 %v827_v12, %v569_v8  ;;  %v1084_v26 = vadd.f32 %v828_v14, %v570_v13  ;;  %v830_v27 = vmul.f32 %v1673_v1, %v315_v9  ;;  %v319_v29 = vld [vmem:[%s2963_s2 + $0x100] sm:$0xff]  ;;  %v64_v30 = vld [vmem:[#allocation3 + $0x108] sm:$0xff]  ;;  %v65_v36 = vld [vmem:[#allocation3 + $0x110] sm:$0xff] }
  0x27   :  { %v573_v28 = vmul.f32 %v1671_v0, %v60_v10  ;;  %1338 = vst [vmem:[#allocation6 + $0xc0] sm:$0xff] %v1082_v18  ;;  %v1085_v31 = vadd.f32 %v829_v20, %v571_v19  ;;  %v831_v32 = vmul.f32 %v1673_v1, %v316_v15  ;;  %v574_v33 = vmul.f32 %v1671_v0, %v61_v16  ;;  %v320_v35 = vld [vmem:[%s2963_s2 + $0x108] sm:$0xff]  ;;  %v321_v37 = vld [vmem:[%s2963_s2 + $0x110] sm:$0xff]  ;;  %v66_v42 = vld [vmem:[#allocation3 + $0x118] sm:$0xff] }
  0x28   :  { %v832_v34 = vmul.f32 %v1673_v1, %v317_v17  ;;  %1339 = vst [vmem:[#allocation6 + $0xc8] sm:$0xff] %v1083_v25  ;;  %1340 = vst [vmem:[#allocation6 + $0xd0] sm:$0xff] %v1084_v26  ;;  %v1086_v38 = vadd.f32 %v830_v27, %v572_v21  ;;  %v575_v39 = vmul.f32 %v1671_v0, %v62_v22  ;;  %v322_v43 = vld [vmem:[%s2963_s2 + $0x118] sm:$0xff]  ;;  %v67_v44 = vld [vmem:[#allocation3 + $0x120] sm:$0xff] }
  0x29   :  { %v833_v40 = vmul.f32 %v1673_v1, %v318_v23  ;;  %v576_v41 = vmul.f32 %v1671_v0, %v63_v24  ;;  %1341 = vst [vmem:[#allocation6 + $0xd8] sm:$0xff] %v1085_v31  ;;  %v1087_v45 = vadd.f32 %v831_v32, %v573_v28  ;;  %v834_v47 = vmul.f32 %v1673_v1, %v319_v29  ;;  %v323_v49 = vld [vmem:[%s2963_s2 + $0x120] sm:$0xff]  ;;  %v68_v50 = vld [vmem:[#allocation3 + $0x128] sm:$0xff]  ;;  %v69_v56 = vld [vmem:[#allocation3 + $0x130] sm:$0xff] }
  0x2a   :  { %v1088_v46 = vadd.f32 %v832_v34, %v574_v33  ;;  %v577_v48 = vmul.f32 %v1671_v0, %v64_v30  ;;  %1342 = vst [vmem:[#allocation6 + $0xe0] sm:$0xff] %v1086_v38  ;;  %v835_v52 = vmul.f32 %v1673_v1, %v320_v35  ;;  %v578_v53 = vmul.f32 %v1671_v0, %v65_v36  ;;  %v324_v55 = vld [vmem:[%s2963_s2 + $0x128] sm:$0xff]  ;;  %v325_v57 = vld [vmem:[%s2963_s2 + $0x130] sm:$0xff]  ;;  %v70_v62 = vld [vmem:[#allocation3 + $0x138] sm:$0xff] }
  0x2b   :  { %v1089_v51 = vadd.f32 %v833_v40, %v575_v39  ;;  %v836_v54 = vmul.f32 %v1673_v1, %v321_v37  ;;  %1343 = vst [vmem:[#allocation6 + $0xe8] sm:$0xff] %v1087_v45  ;;  %v1090_v58 = vadd.f32 %v834_v47, %v576_v41  ;;  %v579_v59 = vmul.f32 %v1671_v0, %v66_v42  ;;  %v326_v63 = vld [vmem:[%s2963_s2 + $0x138] sm:$0xff]  ;;  %v71_v2 = vld [vmem:[#allocation3 + $0x140] sm:$0xff]  ;;  %v72_v8 = vld [vmem:[#allocation3 + $0x148] sm:$0xff] }
  0x2c   :  { %1344 = vst [vmem:[#allocation6 + $0xf0] sm:$0xff] %v1088_v46  ;;  %v837_v60 = vmul.f32 %v1673_v1, %v322_v43  ;;  %v580_v61 = vmul.f32 %v1671_v0, %v67_v44  ;;  %v1091_v3 = vadd.f32 %v835_v52, %v577_v48  ;;  %v838_v5 = vmul.f32 %v1673_v1, %v323_v49  ;;  %v327_v7 = vld [vmem:[%s2963_s2 + $0x140] sm:$0xff]  ;;  %v328_v13 = vld [vmem:[%s2963_s2 + $0x148] sm:$0xff]  ;;  %v73_v14 = vld [vmem:[#allocation3 + $0x150] sm:$0xff] }
  0x2d   :  { %1345 = vst [vmem:[#allocation6 + $0xf8] sm:$0xff] %v1089_v51  ;;  %v1092_v4 = vadd.f32 %v836_v54, %v578_v53  ;;  %v581_v6 = vmul.f32 %v1671_v0, %v68_v50  ;;  %1346 = vst [vmem:[#allocation6 + $0x100] sm:$0xff] %v1090_v58  ;;  %v839_v10 = vmul.f32 %v1673_v1, %v324_v55  ;;  %v329_v15 = vld [vmem:[%s2963_s2 + $0x150] sm:$0xff]  ;;  %v74_v20 = vld [vmem:[#allocation3 + $0x158] sm:$0xff] }
  0x2e   :  { %v1093_v9 = vadd.f32 %v837_v60, %v579_v59  ;;  %v582_v11 = vmul.f32 %v1671_v0, %v69_v56  ;;  %v840_v12 = vmul.f32 %v1673_v1, %v325_v57  ;;  %1347 = vst [vmem:[#allocation6 + $0x108] sm:$0xff] %v1091_v3  ;;  %v1094_v16 = vadd.f32 %v838_v5, %v580_v61  ;;  %v330_v21 = vld [vmem:[%s2963_s2 + $0x158] sm:$0xff]  ;;  %v75_v22 = vld [vmem:[#allocation3 + $0x160] sm:$0xff]  ;;  %v76_v28 = vld [vmem:[#allocation3 + $0x168] sm:$0xff] }
  0x2f   :  { %1348 = vst [vmem:[#allocation6 + $0x110] sm:$0xff] %v1092_v4  ;;  %v583_v17 = vmul.f32 %v1671_v0, %v70_v62  ;;  %v841_v18 = vmul.f32 %v1673_v1, %v326_v63  ;;  %v584_v19 = vmul.f32 %v1671_v0, %v71_v2  ;;  %v1095_v23 = vadd.f32 %v839_v10, %v581_v6  ;;  %v331_v27 = vld [vmem:[%s2963_s2 + $0x160] sm:$0xff]  ;;  %v332_v33 = vld [vmem:[%s2963_s2 + $0x168] sm:$0xff]  ;;  %v77_v34 = vld [vmem:[#allocation3 + $0x170] sm:$0xff] }
  0x30   :  { %1349 = vst [vmem:[#allocation6 + $0x118] sm:$0xff] %v1093_v9  ;;  %v1096_v24 = vadd.f32 %v840_v12, %v582_v11  ;;  %v842_v25 = vmul.f32 %v1673_v1, %v327_v7  ;;  %v585_v26 = vmul.f32 %v1671_v0, %v72_v8  ;;  %1350 = vst [vmem:[#allocation6 + $0x120] sm:$0xff] %v1094_v16  ;;  %v333_v35 = vld [vmem:[%s2963_s2 + $0x170] sm:$0xff]  ;;  %v78_v40 = vld [vmem:[#allocation3 + $0x178] sm:$0xff] }
  0x31   :  { %v1097_v29 = vadd.f32 %v841_v18, %v583_v17  ;;  %v843_v30 = vmul.f32 %v1673_v1, %v328_v13  ;;  %v586_v31 = vmul.f32 %v1671_v0, %v73_v14  ;;  %v844_v32 = vmul.f32 %v1673_v1, %v329_v15  ;;  %1351 = vst [vmem:[#allocation6 + $0x128] sm:$0xff] %v1095_v23  ;;  %v334_v41 = vld [vmem:[%s2963_s2 + $0x178] sm:$0xff]  ;;  %v79_v42 = vld [vmem:[#allocation3 + $0x180] sm:$0xff]  ;;  %v80_v48 = vld [vmem:[#allocation3 + $0x188] sm:$0xff] }
  0x32   :  { %1352 = vst [vmem:[#allocation6 + $0x130] sm:$0xff] %v1096_v24  ;;  %v1098_v36 = vadd.f32 %v842_v25, %v584_v19  ;;  %v587_v37 = vmul.f32 %v1671_v0, %v74_v20  ;;  %v845_v38 = vmul.f32 %v1673_v1, %v330_v21  ;;  %v588_v39 = vmul.f32 %v1671_v0, %v75_v22  ;;  %v335_v47 = vld [vmem:[%s2963_s2 + $0x180] sm:$0xff]  ;;  %v336_v53 = vld [vmem:[%s2963_s2 + $0x188] sm:$0xff]  ;;  %v81_v54 = vld [vmem:[#allocation3 + $0x190] sm:$0xff] }
  0x33   :  { %1353 = vst [vmem:[#allocation6 + $0x138] sm:$0xff] %v1097_v29  ;;  %v1099_v43 = vadd.f32 %v843_v30, %v585_v26  ;;  %v1100_v44 = vadd.f32 %v844_v32, %v586_v31  ;;  %v846_v45 = vmul.f32 %v1673_v1, %v331_v27  ;;  %v589_v46 = vmul.f32 %v1671_v0, %v76_v28  ;;  %v337_v55 = vld [vmem:[%s2963_s2 + $0x190] sm:$0xff]  ;;  %v82_v60 = vld [vmem:[#allocation3 + $0x198] sm:$0xff]  ;;  %v83_v62 = vld [vmem:[#allocation3 + $0x1a0] sm:$0xff] }
  0x34   :  { %1354 = vst [vmem:[#allocation6 + $0x140] sm:$0xff] %v1098_v36  ;;  %v1101_v49 = vadd.f32 %v845_v38, %v587_v37  ;;  %v847_v50 = vmul.f32 %v1673_v1, %v332_v33  ;;  %v590_v51 = vmul.f32 %v1671_v0, %v77_v34  ;;  %v848_v52 = vmul.f32 %v1673_v1, %v333_v35  ;;  %v338_v61 = vld [vmem:[%s2963_s2 + $0x198] sm:$0xff]  ;;  %v339_v5 = vld [vmem:[%s2963_s2 + $0x1a0] sm:$0xff]  ;;  %v84_v6 = vld [vmem:[#allocation3 + $0x1a8] sm:$0xff] }
  0x35   :  { %1355 = vst [vmem:[#allocation6 + $0x148] sm:$0xff] %v1099_v43  ;;  %1356 = vst [vmem:[#allocation6 + $0x150] sm:$0xff] %v1100_v44  ;;  %v1102_v56 = vadd.f32 %v846_v45, %v588_v39  ;;  %v591_v57 = vmul.f32 %v1671_v0, %v78_v40  ;;  %v849_v58 = vmul.f32 %v1673_v1, %v334_v41  ;;  %v340_v11 = vld [vmem:[%s2963_s2 + $0x1a8] sm:$0xff]  ;;  %v85_v12 = vld [vmem:[#allocation3 + $0x1b0] sm:$0xff] }
  0x36   :  { %v592_v59 = vmul.f32 %v1671_v0, %v79_v42  ;;  %1357 = vst [vmem:[#allocation6 + $0x158] sm:$0xff] %v1101_v49  ;;  %v1103_v63 = vadd.f32 %v847_v50, %v589_v46  ;;  %v1104_v2 = vadd.f32 %v848_v52, %v590_v51  ;;  %v850_v3 = vmul.f32 %v1673_v1, %v335_v47  ;;  %v341_v13 = vld [vmem:[%s2963_s2 + $0x1b0] sm:$0xff]  ;;  %v86_v18 = vld [vmem:[#allocation3 + $0x1b8] sm:$0xff]  ;;  %v87_v20 = vld [vmem:[#allocation3 + $0x1c0] sm:$0xff] }
  0x37   :  { %v593_v4 = vmul.f32 %v1671_v0, %v80_v48  ;;  %1358 = vst [vmem:[#allocation6 + $0x160] sm:$0xff] %v1102_v56  ;;  %v1105_v7 = vadd.f32 %v849_v58, %v591_v57  ;;  %v851_v8 = vmul.f32 %v1673_v1, %v336_v53  ;;  %v594_v9 = vmul.f32 %v1671_v0, %v81_v54  ;;  %v342_v19 = vld [vmem:[%s2963_s2 + $0x1b8] sm:$0xff]  ;;  %v343_v25 = vld [vmem:[%s2963_s2 + $0x1c0] sm:$0xff]  ;;  %v88_v26 = vld [vmem:[#allocation3 + $0x1c8] sm:$0xff] }
  0x38   :  { %v852_v10 = vmul.f32 %v1673_v1, %v337_v55  ;;  %1359 = vst [vmem:[#allocation6 + $0x168] sm:$0xff] %v1103_v63  ;;  %1360 = vst [vmem:[#allocation6 + $0x170] sm:$0xff] %v1104_v2  ;;  %v1106_v14 = vadd.f32 %v850_v3, %v592_v59  ;;  %v595_v15 = vmul.f32 %v1671_v0, %v82_v60  ;;  %v344_v31 = vld [vmem:[%s2963_s2 + $0x1c8] sm:$0xff]  ;;  %v89_v32 = vld [vmem:[#allocation3 + $0x1d0] sm:$0xff] }
  0x39   :  { %v853_v16 = vmul.f32 %v1673_v1, %v338_v61  ;;  %v596_v17 = vmul.f32 %v1671_v0, %v83_v62  ;;  %1361 = vst [vmem:[#allocation6 + $0x178] sm:$0xff] %v1105_v7  ;;  %v1107_v21 = vadd.f32 %v851_v8, %v593_v4  ;;  %v854_v23 = vmul.f32 %v1673_v1, %v339_v5  ;;  %v345_v33 = vld [vmem:[%s2963_s2 + $0x1d0] sm:$0xff]  ;;  %v90_v38 = vld [vmem:[#allocation3 + $0x1d8] sm:$0xff]  ;;  %v91_v40 = vld [vmem:[#allocation3 + $0x1e0] sm:$0xff] }
  0x3a   :  { %v1108_v22 = vadd.f32 %v852_v10, %v594_v9  ;;  %v597_v24 = vmul.f32 %v1671_v0, %v84_v6  ;;  %1362 = vst [vmem:[#allocation6 + $0x180] sm:$0xff] %v1106_v14  ;;  %v855_v28 = vmul.f32 %v1673_v1, %v340_v11  ;;  %v598_v29 = vmul.f32 %v1671_v0, %v85_v12  ;;  %v346_v39 = vld [vmem:[%s2963_s2 + $0x1d8] sm:$0xff]  ;;  %v347_v45 = vld [vmem:[%s2963_s2 + $0x1e0] sm:$0xff]  ;;  %v92_v46 = vld [vmem:[#allocation3 + $0x1e8] sm:$0xff] }
  0x3b   :  { %v1109_v27 = vadd.f32 %v853_v16, %v595_v15  ;;  %v856_v30 = vmul.f32 %v1673_v1, %v341_v13  ;;  %1363 = vst [vmem:[#allocation6 + $0x188] sm:$0xff] %v1107_v21  ;;  %v1110_v34 = vadd.f32 %v854_v23, %v596_v17  ;;  %v599_v35 = vmul.f32 %v1671_v0, %v86_v18  ;;  %v348_v51 = vld [vmem:[%s2963_s2 + $0x1e8] sm:$0xff]  ;;  %v93_v52 = vld [vmem:[#allocation3 + $0x1f0] sm:$0xff]  ;;  %v94_v58 = vld [vmem:[#allocation3 + $0x1f8] sm:$0xff] }
  0x3c   :  { %1364 = vst [vmem:[#allocation6 + $0x190] sm:$0xff] %v1108_v22  ;;  %v857_v36 = vmul.f32 %v1673_v1, %v342_v19  ;;  %v600_v37 = vmul.f32 %v1671_v0, %v87_v20  ;;  %v1111_v41 = vadd.f32 %v855_v28, %v597_v24  ;;  %v858_v43 = vmul.f32 %v1673_v1, %v343_v25  ;;  %v349_v53 = vld [vmem:[%s2963_s2 + $0x1f0] sm:$0xff]  ;;  %v350_v59 = vld [vmem:[%s2963_s2 + $0x1f8] sm:$0xff]  ;;  %v95_v60 = vld [vmem:[#allocation3 + $0x200] sm:$0xff] }
  0x3d   :  { %1365 = vst [vmem:[#allocation6 + $0x198] sm:$0xff] %v1109_v27  ;;  %v1112_v42 = vadd.f32 %v856_v30, %v598_v29  ;;  %v601_v44 = vmul.f32 %v1671_v0, %v88_v26  ;;  %1366 = vst [vmem:[#allocation6 + $0x1a0] sm:$0xff] %v1110_v34  ;;  %v859_v48 = vmul.f32 %v1673_v1, %v344_v31  ;;  %v351_v3 = vld [vmem:[%s2963_s2 + $0x200] sm:$0xff]  ;;  %v96_v4 = vld [vmem:[#allocation3 + $0x208] sm:$0xff] }
  0x3e   :  { %v1113_v47 = vadd.f32 %v857_v36, %v599_v35  ;;  %v602_v49 = vmul.f32 %v1671_v0, %v89_v32  ;;  %v860_v50 = vmul.f32 %v1673_v1, %v345_v33  ;;  %1367 = vst [vmem:[#allocation6 + $0x1a8] sm:$0xff] %v1111_v41  ;;  %v1114_v54 = vadd.f32 %v858_v43, %v600_v37  ;;  %v352_v9 = vld [vmem:[%s2963_s2 + $0x208] sm:$0xff]  ;;  %v97_v10 = vld [vmem:[#allocation3 + $0x210] sm:$0xff]  ;;  %v98_v16 = vld [vmem:[#allocation3 + $0x218] sm:$0xff] }
  0x3f   :  { %1368 = vst [vmem:[#allocation6 + $0x1b0] sm:$0xff] %v1112_v42  ;;  %v603_v55 = vmul.f32 %v1671_v0, %v90_v38  ;;  %v861_v56 = vmul.f32 %v1673_v1, %v346_v39  ;;  %v604_v57 = vmul.f32 %v1671_v0, %v91_v40  ;;  %v1115_v61 = vadd.f32 %v859_v48, %v601_v44  ;;  %v353_v11 = vld [vmem:[%s2963_s2 + $0x210] sm:$0xff]  ;;  %v354_v17 = vld [vmem:[%s2963_s2 + $0x218] sm:$0xff]  ;;  %v99_v18 = vld [vmem:[#allocation3 + $0x220] sm:$0xff] }
  0x40   :  { %1369 = vst [vmem:[#allocation6 + $0x1b8] sm:$0xff] %v1113_v47  ;;  %v1116_v62 = vadd.f32 %v860_v50, %v602_v49  ;;  %v862_v63 = vmul.f32 %v1673_v1, %v347_v45  ;;  %v605_v2 = vmul.f32 %v1671_v0, %v92_v46  ;;  %1370 = vst [vmem:[#allocation6 + $0x1c0] sm:$0xff] %v1114_v54  ;;  %v355_v23 = vld [vmem:[%s2963_s2 + $0x220] sm:$0xff]  ;;  %v100_v24 = vld [vmem:[#allocation3 + $0x228] sm:$0xff] }
  0x41   :  { %v1117_v5 = vadd.f32 %v861_v56, %v603_v55  ;;  %v863_v6 = vmul.f32 %v1673_v1, %v348_v51  ;;  %v606_v7 = vmul.f32 %v1671_v0, %v93_v52  ;;  %v864_v8 = vmul.f32 %v1673_v1, %v349_v53  ;;  %1371 = vst [vmem:[#allocation6 + $0x1c8] sm:$0xff] %v1115_v61  ;;  %v356_v29 = vld [vmem:[%s2963_s2 + $0x228] sm:$0xff]  ;;  %v101_v30 = vld [vmem:[#allocation3 + $0x230] sm:$0xff]  ;;  %v102_v36 = vld [vmem:[#allocation3 + $0x238] sm:$0xff] }
  0x42   :  { %1372 = vst [vmem:[#allocation6 + $0x1d0] sm:$0xff] %v1116_v62  ;;  %v1118_v12 = vadd.f32 %v862_v63, %v604_v57  ;;  %v607_v13 = vmul.f32 %v1671_v0, %v94_v58  ;;  %v865_v14 = vmul.f32 %v1673_v1, %v350_v59  ;;  %v608_v15 = vmul.f32 %v1671_v0, %v95_v60  ;;  %v357_v31 = vld [vmem:[%s2963_s2 + $0x230] sm:$0xff]  ;;  %v358_v37 = vld [vmem:[%s2963_s2 + $0x238] sm:$0xff]  ;;  %v103_v38 = vld [vmem:[#allocation3 + $0x240] sm:$0xff] }
  0x43   :  { %1373 = vst [vmem:[#allocation6 + $0x1d8] sm:$0xff] %v1117_v5  ;;  %v1119_v19 = vadd.f32 %v863_v6, %v605_v2  ;;  %v1120_v20 = vadd.f32 %v864_v8, %v606_v7  ;;  %v866_v21 = vmul.f32 %v1673_v1, %v351_v3  ;;  %v609_v22 = vmul.f32 %v1671_v0, %v96_v4  ;;  %v359_v43 = vld [vmem:[%s2963_s2 + $0x240] sm:$0xff]  ;;  %v104_v44 = vld [vmem:[#allocation3 + $0x248] sm:$0xff]  ;;  %v105_v50 = vld [vmem:[#allocation3 + $0x250] sm:$0xff] }
  0x44   :  { %1374 = vst [vmem:[#allocation6 + $0x1e0] sm:$0xff] %v1118_v12  ;;  %v1121_v25 = vadd.f32 %v865_v14, %v607_v13  ;;  %v867_v26 = vmul.f32 %v1673_v1, %v352_v9  ;;  %v610_v27 = vmul.f32 %v1671_v0, %v97_v10  ;;  %v868_v28 = vmul.f32 %v1673_v1, %v353_v11  ;;  %v360_v49 = vld [vmem:[%s2963_s2 + $0x248] sm:$0xff]  ;;  %v361_v51 = vld [vmem:[%s2963_s2 + $0x250] sm:$0xff]  ;;  %v106_v56 = vld [vmem:[#allocation3 + $0x258] sm:$0xff] }
  0x45   :  { %1375 = vst [vmem:[#allocation6 + $0x1e8] sm:$0xff] %v1119_v19  ;;  %1376 = vst [vmem:[#allocation6 + $0x1f0] sm:$0xff] %v1120_v20  ;;  %v1122_v32 = vadd.f32 %v866_v21, %v608_v15  ;;  %v611_v33 = vmul.f32 %v1671_v0, %v98_v16  ;;  %v869_v34 = vmul.f32 %v1673_v1, %v354_v17  ;;  %v362_v57 = vld [vmem:[%s2963_s2 + $0x258] sm:$0xff]  ;;  %v107_v58 = vld [vmem:[#allocation3 + $0x260] sm:$0xff] }
  0x46   :  { %v612_v35 = vmul.f32 %v1671_v0, %v99_v18  ;;  %1377 = vst [vmem:[#allocation6 + $0x1f8] sm:$0xff] %v1121_v25  ;;  %v1123_v39 = vadd.f32 %v867_v26, %v609_v22  ;;  %v1124_v40 = vadd.f32 %v868_v28, %v610_v27  ;;  %v870_v41 = vmul.f32 %v1673_v1, %v355_v23  ;;  %v363_v63 = vld [vmem:[%s2963_s2 + $0x260] sm:$0xff]  ;;  %v108_v2 = vld [vmem:[#allocation3 + $0x268] sm:$0xff]  ;;  %v109_v8 = vld [vmem:[#allocation3 + $0x270] sm:$0xff] }
  0x47   :  { %v613_v42 = vmul.f32 %v1671_v0, %v100_v24  ;;  %1378 = vst [vmem:[#allocation6 + $0x200] sm:$0xff] %v1122_v32  ;;  %v1125_v45 = vadd.f32 %v869_v34, %v611_v33  ;;  %v871_v46 = vmul.f32 %v1673_v1, %v356_v29  ;;  %v614_v47 = vmul.f32 %v1671_v0, %v101_v30  ;;  %v364_v7 = vld [vmem:[%s2963_s2 + $0x268] sm:$0xff]  ;;  %v365_v9 = vld [vmem:[%s2963_s2 + $0x270] sm:$0xff]  ;;  %v110_v14 = vld [vmem:[#allocation3 + $0x278] sm:$0xff] }
  0x48   :  { %v872_v48 = vmul.f32 %v1673_v1, %v357_v31  ;;  %1379 = vst [vmem:[#allocation6 + $0x208] sm:$0xff] %v1123_v39  ;;  %1380 = vst [vmem:[#allocation6 + $0x210] sm:$0xff] %v1124_v40  ;;  %v1126_v52 = vadd.f32 %v870_v41, %v612_v35  ;;  %v615_v53 = vmul.f32 %v1671_v0, %v102_v36  ;;  %v366_v15 = vld [vmem:[%s2963_s2 + $0x278] sm:$0xff]  ;;  %v111_v16 = vld [vmem:[#allocation3 + $0x280] sm:$0xff] }
  0x49   :  { %v873_v54 = vmul.f32 %v1673_v1, %v358_v37  ;;  %v616_v55 = vmul.f32 %v1671_v0, %v103_v38  ;;  %1381 = vst [vmem:[#allocation6 + $0x218] sm:$0xff] %v1125_v45  ;;  %v1127_v59 = vadd.f32 %v871_v46, %v613_v42  ;;  %v874_v61 = vmul.f32 %v1673_v1, %v359_v43  ;;  %v367_v21 = vld [vmem:[%s2963_s2 + $0x280] sm:$0xff]  ;;  %v112_v22 = vld [vmem:[#allocation3 + $0x288] sm:$0xff]  ;;  %v113_v28 = vld [vmem:[#allocation3 + $0x290] sm:$0xff] }
  0x4a   :  { %v1128_v60 = vadd.f32 %v872_v48, %v614_v47  ;;  %v617_v62 = vmul.f32 %v1671_v0, %v104_v44  ;;  %1382 = vst [vmem:[#allocation6 + $0x220] sm:$0xff] %v1126_v52  ;;  %v875_v4 = vmul.f32 %v1673_v1, %v360_v49  ;;  %v618_v5 = vmul.f32 %v1671_v0, %v105_v50  ;;  %v368_v27 = vld [vmem:[%s2963_s2 + $0x288] sm:$0xff]  ;;  %v369_v29 = vld [vmem:[%s2963_s2 + $0x290] sm:$0xff]  ;;  %v114_v34 = vld [vmem:[#allocation3 + $0x298] sm:$0xff] }
  0x4b   :  { %v1129_v3 = vadd.f32 %v873_v54, %v615_v53  ;;  %v876_v6 = vmul.f32 %v1673_v1, %v361_v51  ;;  %1383 = vst [vmem:[#allocation6 + $0x228] sm:$0xff] %v1127_v59  ;;  %v1130_v10 = vadd.f32 %v874_v61, %v616_v55  ;;  %v619_v11 = vmul.f32 %v1671_v0, %v106_v56  ;;  %v370_v35 = vld [vmem:[%s2963_s2 + $0x298] sm:$0xff]  ;;  %v115_v36 = vld [vmem:[#allocation3 + $0x2a0] sm:$0xff]  ;;  %v116_v42 = vld [vmem:[#allocation3 + $0x2a8] sm:$0xff] }
  0x4c   :  { %1384 = vst [vmem:[#allocation6 + $0x230] sm:$0xff] %v1128_v60  ;;  %v877_v12 = vmul.f32 %v1673_v1, %v362_v57  ;;  %v620_v13 = vmul.f32 %v1671_v0, %v107_v58  ;;  %v1131_v17 = vadd.f32 %v875_v4, %v617_v62  ;;  %v878_v19 = vmul.f32 %v1673_v1, %v363_v63  ;;  %v371_v41 = vld [vmem:[%s2963_s2 + $0x2a0] sm:$0xff]  ;;  %v372_v47 = vld [vmem:[%s2963_s2 + $0x2a8] sm:$0xff]  ;;  %v117_v48 = vld [vmem:[#allocation3 + $0x2b0] sm:$0xff] }
  0x4d   :  { %1385 = vst [vmem:[#allocation6 + $0x238] sm:$0xff] %v1129_v3  ;;  %v1132_v18 = vadd.f32 %v876_v6, %v618_v5  ;;  %v621_v20 = vmul.f32 %v1671_v0, %v108_v2  ;;  %1386 = vst [vmem:[#allocation6 + $0x240] sm:$0xff] %v1130_v10  ;;  %v879_v24 = vmul.f32 %v1673_v1, %v364_v7  ;;  %v373_v49 = vld [vmem:[%s2963_s2 + $0x2b0] sm:$0xff]  ;;  %v118_v54 = vld [vmem:[#allocation3 + $0x2b8] sm:$0xff] }
  0x4e   :  { %v1133_v23 = vadd.f32 %v877_v12, %v619_v11  ;;  %v622_v25 = vmul.f32 %v1671_v0, %v109_v8  ;;  %v880_v26 = vmul.f32 %v1673_v1, %v365_v9  ;;  %1387 = vst [vmem:[#allocation6 + $0x248] sm:$0xff] %v1131_v17  ;;  %v1134_v30 = vadd.f32 %v878_v19, %v620_v13  ;;  %v374_v55 = vld [vmem:[%s2963_s2 + $0x2b8] sm:$0xff]  ;;  %v119_v56 = vld [vmem:[#allocation3 + $0x2c0] sm:$0xff]  ;;  %v120_v62 = vld [vmem:[#allocation3 + $0x2c8] sm:$0xff] }
  0x4f   :  { %1388 = vst [vmem:[#allocation6 + $0x250] sm:$0xff] %v1132_v18  ;;  %v623_v31 = vmul.f32 %v1671_v0, %v110_v14  ;;  %v881_v32 = vmul.f32 %v1673_v1, %v366_v15  ;;  %v624_v33 = vmul.f32 %v1671_v0, %v111_v16  ;;  %v1135_v37 = vadd.f32 %v879_v24, %v621_v20  ;;  %v375_v61 = vld [vmem:[%s2963_s2 + $0x2c0] sm:$0xff]  ;;  %v376_v5 = vld [vmem:[%s2963_s2 + $0x2c8] sm:$0xff]  ;;  %v121_v6 = vld [vmem:[#allocation3 + $0x2d0] sm:$0xff] }
  0x50   :  { %1389 = vst [vmem:[#allocation6 + $0x258] sm:$0xff] %v1133_v23  ;;  %v1136_v38 = vadd.f32 %v880_v26, %v622_v25  ;;  %v882_v39 = vmul.f32 %v1673_v1, %v367_v21  ;;  %v625_v40 = vmul.f32 %v1671_v0, %v112_v22  ;;  %1390 = vst [vmem:[#allocation6 + $0x260] sm:$0xff] %v1134_v30  ;;  %v377_v7 = vld [vmem:[%s2963_s2 + $0x2d0] sm:$0xff]  ;;  %v122_v12 = vld [vmem:[#allocation3 + $0x2d8] sm:$0xff] }
  0x51   :  { %v1137_v43 = vadd.f32 %v881_v32, %v623_v31  ;;  %v883_v44 = vmul.f32 %v1673_v1, %v368_v27  ;;  %v626_v45 = vmul.f32 %v1671_v0, %v113_v28  ;;  %v884_v46 = vmul.f32 %v1673_v1, %v369_v29  ;;  %1391 = vst [vmem:[#allocation6 + $0x268] sm:$0xff] %v1135_v37  ;;  %v378_v13 = vld [vmem:[%s2963_s2 + $0x2d8] sm:$0xff]  ;;  %v123_v14 = vld [vmem:[#allocation3 + $0x2e0] sm:$0xff]  ;;  %v124_v20 = vld [vmem:[#allocation3 + $0x2e8] sm:$0xff] }
  0x52   :  { %1392 = vst [vmem:[#allocation6 + $0x270] sm:$0xff] %v1136_v38  ;;  %v1138_v50 = vadd.f32 %v882_v39, %v624_v33  ;;  %v627_v51 = vmul.f32 %v1671_v0, %v114_v34  ;;  %v885_v52 = vmul.f32 %v1673_v1, %v370_v35  ;;  %v628_v53 = vmul.f32 %v1671_v0, %v115_v36  ;;  %v379_v19 = vld [vmem:[%s2963_s2 + $0x2e0] sm:$0xff]  ;;  %v380_v25 = vld [vmem:[%s2963_s2 + $0x2e8] sm:$0xff]  ;;  %v125_v26 = vld [vmem:[#allocation3 + $0x2f0] sm:$0xff] }
  0x53   :  { %1393 = vst [vmem:[#allocation6 + $0x278] sm:$0xff] %v1137_v43  ;;  %v1139_v57 = vadd.f32 %v883_v44, %v625_v40  ;;  %v1140_v58 = vadd.f32 %v884_v46, %v626_v45  ;;  %v886_v59 = vmul.f32 %v1673_v1, %v371_v41  ;;  %v629_v60 = vmul.f32 %v1671_v0, %v116_v42  ;;  %v381_v27 = vld [vmem:[%s2963_s2 + $0x2f0] sm:$0xff]  ;;  %v126_v32 = vld [vmem:[#allocation3 + $0x2f8] sm:$0xff]  ;;  %v127_v34 = vld [vmem:[#allocation3 + $0x300] sm:$0xff] }
  0x54   :  { %1394 = vst [vmem:[#allocation6 + $0x280] sm:$0xff] %v1138_v50  ;;  %v1141_v63 = vadd.f32 %v885_v52, %v627_v51  ;;  %v887_v2 = vmul.f32 %v1673_v1, %v372_v47  ;;  %v630_v3 = vmul.f32 %v1671_v0, %v117_v48  ;;  %v888_v4 = vmul.f32 %v1673_v1, %v373_v49  ;;  %v382_v33 = vld [vmem:[%s2963_s2 + $0x2f8] sm:$0xff]  ;;  %v383_v39 = vld [vmem:[%s2963_s2 + $0x300] sm:$0xff]  ;;  %v128_v40 = vld [vmem:[#allocation3 + $0x308] sm:$0xff] }
  0x55   :  { %1395 = vst [vmem:[#allocation6 + $0x288] sm:$0xff] %v1139_v57  ;;  %1396 = vst [vmem:[#allocation6 + $0x290] sm:$0xff] %v1140_v58  ;;  %v1142_v8 = vadd.f32 %v886_v59, %v628_v53  ;;  %v631_v9 = vmul.f32 %v1671_v0, %v118_v54  ;;  %v889_v10 = vmul.f32 %v1673_v1, %v374_v55  ;;  %v384_v45 = vld [vmem:[%s2963_s2 + $0x308] sm:$0xff]  ;;  %v129_v46 = vld [vmem:[#allocation3 + $0x310] sm:$0xff] }
  0x56   :  { %v632_v11 = vmul.f32 %v1671_v0, %v119_v56  ;;  %1397 = vst [vmem:[#allocation6 + $0x298] sm:$0xff] %v1141_v63  ;;  %v1143_v15 = vadd.f32 %v887_v2, %v629_v60  ;;  %v1144_v16 = vadd.f32 %v888_v4, %v630_v3  ;;  %v890_v17 = vmul.f32 %v1673_v1, %v375_v61  ;;  %v385_v47 = vld [vmem:[%s2963_s2 + $0x310] sm:$0xff]  ;;  %v130_v52 = vld [vmem:[#allocation3 + $0x318] sm:$0xff]  ;;  %v131_v54 = vld [vmem:[#allocation3 + $0x320] sm:$0xff] }
  0x57   :  { %v633_v18 = vmul.f32 %v1671_v0, %v120_v62  ;;  %1398 = vst [vmem:[#allocation6 + $0x2a0] sm:$0xff] %v1142_v8  ;;  %v1145_v21 = vadd.f32 %v889_v10, %v631_v9  ;;  %v891_v22 = vmul.f32 %v1673_v1, %v376_v5  ;;  %v634_v23 = vmul.f32 %v1671_v0, %v121_v6  ;;  %v386_v53 = vld [vmem:[%s2963_s2 + $0x318] sm:$0xff]  ;;  %v387_v59 = vld [vmem:[%s2963_s2 + $0x320] sm:$0xff]  ;;  %v132_v60 = vld [vmem:[#allocation3 + $0x328] sm:$0xff] }
  0x58   :  { %v892_v24 = vmul.f32 %v1673_v1, %v377_v7  ;;  %1399 = vst [vmem:[#allocation6 + $0x2a8] sm:$0xff] %v1143_v15  ;;  %1400 = vst [vmem:[#allocation6 + $0x2b0] sm:$0xff] %v1144_v16  ;;  %v1146_v28 = vadd.f32 %v890_v17, %v632_v11  ;;  %v635_v29 = vmul.f32 %v1671_v0, %v122_v12  ;;  %v388_v3 = vld [vmem:[%s2963_s2 + $0x328] sm:$0xff]  ;;  %v133_v4 = vld [vmem:[#allocation3 + $0x330] sm:$0xff] }
  0x59   :  { %v893_v30 = vmul.f32 %v1673_v1, %v378_v13  ;;  %v636_v31 = vmul.f32 %v1671_v0, %v123_v14  ;;  %1401 = vst [vmem:[#allocation6 + $0x2b8] sm:$0xff] %v1145_v21  ;;  %v1147_v35 = vadd.f32 %v891_v22, %v633_v18  ;;  %v894_v37 = vmul.f32 %v1673_v1, %v379_v19  ;;  %v389_v5 = vld [vmem:[%s2963_s2 + $0x330] sm:$0xff]  ;;  %v134_v10 = vld [vmem:[#allocation3 + $0x338] sm:$0xff]  ;;  %v135_v12 = vld [vmem:[#allocation3 + $0x340] sm:$0xff] }
  0x5a   :  { %v1148_v36 = vadd.f32 %v892_v24, %v634_v23  ;;  %v637_v38 = vmul.f32 %v1671_v0, %v124_v20  ;;  %1402 = vst [vmem:[#allocation6 + $0x2c0] sm:$0xff] %v1146_v28  ;;  %v895_v42 = vmul.f32 %v1673_v1, %v380_v25  ;;  %v638_v43 = vmul.f32 %v1671_v0, %v125_v26  ;;  %v390_v11 = vld [vmem:[%s2963_s2 + $0x338] sm:$0xff]  ;;  %v391_v17 = vld [vmem:[%s2963_s2 + $0x340] sm:$0xff]  ;;  %v136_v18 = vld [vmem:[#allocation3 + $0x348] sm:$0xff] }
  0x5b   :  { %v1149_v41 = vadd.f32 %v893_v30, %v635_v29  ;;  %v896_v44 = vmul.f32 %v1673_v1, %v381_v27  ;;  %1403 = vst [vmem:[#allocation6 + $0x2c8] sm:$0xff] %v1147_v35  ;;  %v1150_v48 = vadd.f32 %v894_v37, %v636_v31  ;;  %v639_v49 = vmul.f32 %v1671_v0, %v126_v32  ;;  %v392_v23 = vld [vmem:[%s2963_s2 + $0x348] sm:$0xff]  ;;  %v137_v24 = vld [vmem:[#allocation3 + $0x350] sm:$0xff]  ;;  %v138_v30 = vld [vmem:[#allocation3 + $0x358] sm:$0xff] }
  0x5c   :  { %1404 = vst [vmem:[#allocation6 + $0x2d0] sm:$0xff] %v1148_v36  ;;  %v897_v50 = vmul.f32 %v1673_v1, %v382_v33  ;;  %v640_v51 = vmul.f32 %v1671_v0, %v127_v34  ;;  %v1151_v55 = vadd.f32 %v895_v42, %v637_v38  ;;  %v898_v57 = vmul.f32 %v1673_v1, %v383_v39  ;;  %v393_v25 = vld [vmem:[%s2963_s2 + $0x350] sm:$0xff]  ;;  %v394_v31 = vld [vmem:[%s2963_s2 + $0x358] sm:$0xff]  ;;  %v139_v32 = vld [vmem:[#allocation3 + $0x360] sm:$0xff] }
  0x5d   :  { %1405 = vst [vmem:[#allocation6 + $0x2d8] sm:$0xff] %v1149_v41  ;;  %v1152_v56 = vadd.f32 %v896_v44, %v638_v43  ;;  %v641_v58 = vmul.f32 %v1671_v0, %v128_v40  ;;  %1406 = vst [vmem:[#allocation6 + $0x2e0] sm:$0xff] %v1150_v48  ;;  %v899_v62 = vmul.f32 %v1673_v1, %v384_v45  ;;  %v395_v37 = vld [vmem:[%s2963_s2 + $0x360] sm:$0xff]  ;;  %v140_v38 = vld [vmem:[#allocation3 + $0x368] sm:$0xff] }
  0x5e   :  { %v1153_v61 = vadd.f32 %v897_v50, %v639_v49  ;;  %v642_v63 = vmul.f32 %v1671_v0, %v129_v46  ;;  %v900_v2 = vmul.f32 %v1673_v1, %v385_v47  ;;  %1407 = vst [vmem:[#allocation6 + $0x2e8] sm:$0xff] %v1151_v55  ;;  %v1154_v6 = vadd.f32 %v898_v57, %v640_v51  ;;  %v396_v43 = vld [vmem:[%s2963_s2 + $0x368] sm:$0xff]  ;;  %v141_v44 = vld [vmem:[#allocation3 + $0x370] sm:$0xff]  ;;  %v142_v50 = vld [vmem:[#allocation3 + $0x378] sm:$0xff] }
  0x5f   :  { %1408 = vst [vmem:[#allocation6 + $0x2f0] sm:$0xff] %v1152_v56  ;;  %v643_v7 = vmul.f32 %v1671_v0, %v130_v52  ;;  %v901_v8 = vmul.f32 %v1673_v1, %v386_v53  ;;  %v644_v9 = vmul.f32 %v1671_v0, %v131_v54  ;;  %v1155_v13 = vadd.f32 %v899_v62, %v641_v58  ;;  %v397_v45 = vld [vmem:[%s2963_s2 + $0x370] sm:$0xff]  ;;  %v398_v51 = vld [vmem:[%s2963_s2 + $0x378] sm:$0xff]  ;;  %v143_v52 = vld [vmem:[#allocation3 + $0x380] sm:$0xff] }
  0x60   :  { %1409 = vst [vmem:[#allocation6 + $0x2f8] sm:$0xff] %v1153_v61  ;;  %v1156_v14 = vadd.f32 %v900_v2, %v642_v63  ;;  %v902_v15 = vmul.f32 %v1673_v1, %v387_v59  ;;  %v645_v16 = vmul.f32 %v1671_v0, %v132_v60  ;;  %1410 = vst [vmem:[#allocation6 + $0x300] sm:$0xff] %v1154_v6  ;;  %v399_v57 = vld [vmem:[%s2963_s2 + $0x380] sm:$0xff]  ;;  %v144_v58 = vld [vmem:[#allocation3 + $0x388] sm:$0xff] }
  0x61   :  { %v1157_v19 = vadd.f32 %v901_v8, %v643_v7  ;;  %v903_v20 = vmul.f32 %v1673_v1, %v388_v3  ;;  %v646_v21 = vmul.f32 %v1671_v0, %v133_v4  ;;  %v904_v22 = vmul.f32 %v1673_v1, %v389_v5  ;;  %1411 = vst [vmem:[#allocation6 + $0x308] sm:$0xff] %v1155_v13  ;;  %v400_v63 = vld [vmem:[%s2963_s2 + $0x388] sm:$0xff]  ;;  %v145_v2 = vld [vmem:[#allocation3 + $0x390] sm:$0xff]  ;;  %v146_v8 = vld [vmem:[#allocation3 + $0x398] sm:$0xff] }
  0x62   :  { %1412 = vst [vmem:[#allocation6 + $0x310] sm:$0xff] %v1156_v14  ;;  %v1158_v26 = vadd.f32 %v902_v15, %v644_v9  ;;  %v647_v27 = vmul.f32 %v1671_v0, %v134_v10  ;;  %v905_v28 = vmul.f32 %v1673_v1, %v390_v11  ;;  %v648_v29 = vmul.f32 %v1671_v0, %v135_v12  ;;  %v401_v3 = vld [vmem:[%s2963_s2 + $0x390] sm:$0xff]  ;;  %v402_v9 = vld [vmem:[%s2963_s2 + $0x398] sm:$0xff]  ;;  %v147_v10 = vld [vmem:[#allocation3 + $0x3a0] sm:$0xff] }
  0x63   :  { %1413 = vst [vmem:[#allocation6 + $0x318] sm:$0xff] %v1157_v19  ;;  %v1159_v33 = vadd.f32 %v903_v20, %v645_v16  ;;  %v1160_v34 = vadd.f32 %v904_v22, %v646_v21  ;;  %v906_v35 = vmul.f32 %v1673_v1, %v391_v17  ;;  %v649_v36 = vmul.f32 %v1671_v0, %v136_v18  ;;  %v403_v15 = vld [vmem:[%s2963_s2 + $0x3a0] sm:$0xff]  ;;  %v148_v16 = vld [vmem:[#allocation3 + $0x3a8] sm:$0xff]  ;;  %v149_v22 = vld [vmem:[#allocation3 + $0x3b0] sm:$0xff] }
  0x64   :  { %1414 = vst [vmem:[#allocation6 + $0x320] sm:$0xff] %v1158_v26  ;;  %v1161_v39 = vadd.f32 %v905_v28, %v647_v27  ;;  %v907_v40 = vmul.f32 %v1673_v1, %v392_v23  ;;  %v650_v41 = vmul.f32 %v1671_v0, %v137_v24  ;;  %v908_v42 = vmul.f32 %v1673_v1, %v393_v25  ;;  %v404_v21 = vld [vmem:[%s2963_s2 + $0x3a8] sm:$0xff]  ;;  %v405_v23 = vld [vmem:[%s2963_s2 + $0x3b0] sm:$0xff]  ;;  %v150_v28 = vld [vmem:[#allocation3 + $0x3b8] sm:$0xff] }
  0x65   :  { %1415 = vst [vmem:[#allocation6 + $0x328] sm:$0xff] %v1159_v33  ;;  %1416 = vst [vmem:[#allocation6 + $0x330] sm:$0xff] %v1160_v34  ;;  %v1162_v46 = vadd.f32 %v906_v35, %v648_v29  ;;  %v651_v47 = vmul.f32 %v1671_v0, %v138_v30  ;;  %v909_v48 = vmul.f32 %v1673_v1, %v394_v31  ;;  %v406_v29 = vld [vmem:[%s2963_s2 + $0x3b8] sm:$0xff]  ;;  %v151_v30 = vld [vmem:[#allocation3 + $0x3c0] sm:$0xff] }
  0x66   :  { %v652_v49 = vmul.f32 %v1671_v0, %v139_v32  ;;  %1417 = vst [vmem:[#allocation6 + $0x338] sm:$0xff] %v1161_v39  ;;  %v1163_v53 = vadd.f32 %v907_v40, %v649_v36  ;;  %v1164_v54 = vadd.f32 %v908_v42, %v650_v41  ;;  %v910_v55 = vmul.f32 %v1673_v1, %v395_v37  ;;  %v407_v35 = vld [vmem:[%s2963_s2 + $0x3c0] sm:$0xff]  ;;  %v152_v36 = vld [vmem:[#allocation3 + $0x3c8] sm:$0xff]  ;;  %v153_v42 = vld [vmem:[#allocation3 + $0x3d0] sm:$0xff] }
  0x67   :  { %v653_v56 = vmul.f32 %v1671_v0, %v140_v38  ;;  %1418 = vst [vmem:[#allocation6 + $0x340] sm:$0xff] %v1162_v46  ;;  %v1165_v59 = vadd.f32 %v909_v48, %v651_v47  ;;  %v911_v60 = vmul.f32 %v1673_v1, %v396_v43  ;;  %v654_v61 = vmul.f32 %v1671_v0, %v141_v44  ;;  %v408_v41 = vld [vmem:[%s2963_s2 + $0x3c8] sm:$0xff]  ;;  %v409_v43 = vld [vmem:[%s2963_s2 + $0x3d0] sm:$0xff]  ;;  %v154_v48 = vld [vmem:[#allocation3 + $0x3d8] sm:$0xff] }
  0x68   :  { %v912_v62 = vmul.f32 %v1673_v1, %v397_v45  ;;  %1419 = vst [vmem:[#allocation6 + $0x348] sm:$0xff] %v1163_v53  ;;  %1420 = vst [vmem:[#allocation6 + $0x350] sm:$0xff] %v1164_v54  ;;  %v1166_v4 = vadd.f32 %v910_v55, %v652_v49  ;;  %v655_v5 = vmul.f32 %v1671_v0, %v142_v50  ;;  %v410_v49 = vld [vmem:[%s2963_s2 + $0x3d8] sm:$0xff]  ;;  %v155_v50 = vld [vmem:[#allocation3 + $0x3e0] sm:$0xff] }
  0x69   :  { %v913_v6 = vmul.f32 %v1673_v1, %v398_v51  ;;  %v656_v7 = vmul.f32 %v1671_v0, %v143_v52  ;;  %1421 = vst [vmem:[#allocation6 + $0x358] sm:$0xff] %v1165_v59  ;;  %v1167_v11 = vadd.f32 %v911_v60, %v653_v56  ;;  %v914_v13 = vmul.f32 %v1673_v1, %v399_v57  ;;  %v411_v55 = vld [vmem:[%s2963_s2 + $0x3e0] sm:$0xff]  ;;  %v156_v56 = vld [vmem:[#allocation3 + $0x3e8] sm:$0xff] }
  0x6a   :  { %v1168_v12 = vadd.f32 %v912_v62, %v654_v61  ;;  %v657_v14 = vmul.f32 %v1671_v0, %v144_v58  ;;  %1422 = vst [vmem:[#allocation6 + $0x360] sm:$0xff] %v1166_v4  ;;  %v915_v18 = vmul.f32 %v1673_v1, %v400_v63  ;;  %v658_v19 = vmul.f32 %v1671_v0, %v145_v2  ;;  %v412_v61 = vld [vmem:[%s2963_s2 + $0x3e8] sm:$0xff]  ;;  %v157_v62 = vld [vmem:[#allocation3 + $0x3f0] sm:$0xff] }
  0x6b   :  { %v1169_v17 = vadd.f32 %v913_v6, %v655_v5  ;;  %v916_v20 = vmul.f32 %v1673_v1, %v401_v3  ;;  %1423 = vst [vmem:[#allocation6 + $0x368] sm:$0xff] %v1167_v11  ;;  %v1170_v24 = vadd.f32 %v914_v13, %v656_v7  ;;  %v659_v25 = vmul.f32 %v1671_v0, %v146_v8  ;;  %v413_v63 = vld [vmem:[%s2963_s2 + $0x3f0] sm:$0xff]  ;;  %v158_v6 = vld [vmem:[#allocation3 + $0x3f8] sm:$0xff]  ;;  %v159_v8 = vld [vmem:[#allocation3 + $0x400] sm:$0xff] }
  0x6c   :  { %1424 = vst [vmem:[#allocation6 + $0x370] sm:$0xff] %v1168_v12  ;;  %v917_v26 = vmul.f32 %v1673_v1, %v402_v9  ;;  %v660_v27 = vmul.f32 %v1671_v0, %v147_v10  ;;  %v1171_v31 = vadd.f32 %v915_v18, %v657_v14  ;;  %v918_v33 = vmul.f32 %v1673_v1, %v403_v15  ;;  %v414_v7 = vld [vmem:[%s2963_s2 + $0x3f8] sm:$0xff]  ;;  %v415_v13 = vld [vmem:[%s2963_s2 + $0x400] sm:$0xff]  ;;  %v160_v14 = vld [vmem:[#allocation3 + $0x408] sm:$0xff] }
  0x6d   :  { %1425 = vst [vmem:[#allocation6 + $0x378] sm:$0xff] %v1169_v17  ;;  %v1172_v32 = vadd.f32 %v916_v20, %v658_v19  ;;  %v661_v34 = vmul.f32 %v1671_v0, %v148_v16  ;;  %1426 = vst [vmem:[#allocation6 + $0x380] sm:$0xff] %v1170_v24  ;;  %v919_v38 = vmul.f32 %v1673_v1, %v404_v21  ;;  %v416_v19 = vld [vmem:[%s2963_s2 + $0x408] sm:$0xff]  ;;  %v161_v20 = vld [vmem:[#allocation3 + $0x410] sm:$0xff] }
  0x6e   :  { %v1173_v37 = vadd.f32 %v917_v26, %v659_v25  ;;  %v662_v39 = vmul.f32 %v1671_v0, %v149_v22  ;;  %v920_v40 = vmul.f32 %v1673_v1, %v405_v23  ;;  %1427 = vst [vmem:[#allocation6 + $0x388] sm:$0xff] %v1171_v31  ;;  %v1174_v44 = vadd.f32 %v918_v33, %v660_v27  ;;  %v417_v21 = vld [vmem:[%s2963_s2 + $0x410] sm:$0xff]  ;;  %v162_v26 = vld [vmem:[#allocation3 + $0x418] sm:$0xff]  ;;  %v419_v33 = vld [vmem:[%s2963_s2 + $0x420] sm:$0xff] }
  0x6f   :  { %1428 = vst [vmem:[#allocation6 + $0x390] sm:$0xff] %v1172_v32  ;;  %v663_v45 = vmul.f32 %v1671_v0, %v150_v28  ;;  %v921_v46 = vmul.f32 %v1673_v1, %v406_v29  ;;  %v664_v47 = vmul.f32 %v1671_v0, %v151_v30  ;;  %v1175_v51 = vadd.f32 %v919_v38, %v661_v34  ;;  %v418_v27 = vld [vmem:[%s2963_s2 + $0x418] sm:$0xff]  ;;  %v163_v28 = vld [vmem:[#allocation3 + $0x420] sm:$0xff]  ;;  %v164_v34 = vld [vmem:[#allocation3 + $0x428] sm:$0xff] }
  0x70   :  { %1429 = vst [vmem:[#allocation6 + $0x398] sm:$0xff] %v1173_v37  ;;  %v1176_v52 = vadd.f32 %v920_v40, %v662_v39  ;;  %v922_v53 = vmul.f32 %v1673_v1, %v407_v35  ;;  %v665_v54 = vmul.f32 %v1671_v0, %v152_v36  ;;  %1430 = vst [vmem:[#allocation6 + $0x3a0] sm:$0xff] %v1174_v44  ;;  %v420_v39 = vld [vmem:[%s2963_s2 + $0x428] sm:$0xff]  ;;  %v165_v40 = vld [vmem:[#allocation3 + $0x430] sm:$0xff] }
  0x71   :  { %v1177_v57 = vadd.f32 %v921_v46, %v663_v45  ;;  %v923_v58 = vmul.f32 %v1673_v1, %v408_v41  ;;  %v666_v59 = vmul.f32 %v1671_v0, %v153_v42  ;;  %v924_v60 = vmul.f32 %v1673_v1, %v409_v43  ;;  %1431 = vst [vmem:[#allocation6 + $0x3a8] sm:$0xff] %v1175_v51  ;;  %v421_v41 = vld [vmem:[%s2963_s2 + $0x430] sm:$0xff]  ;;  %v166_v46 = vld [vmem:[#allocation3 + $0x438] sm:$0xff] }
  0x72   :  { %1432 = vst [vmem:[#allocation6 + $0x3b0] sm:$0xff] %v1176_v52  ;;  %v1178_v2 = vadd.f32 %v922_v53, %v664_v47  ;;  %v667_v3 = vmul.f32 %v1671_v0, %v154_v48  ;;  %v925_v4 = vmul.f32 %v1673_v1, %v410_v49  ;;  %v668_v5 = vmul.f32 %v1671_v0, %v155_v50  ;;  %v422_v47 = vld [vmem:[%s2963_s2 + $0x438] sm:$0xff]  ;;  %v167_v48 = vld [vmem:[#allocation3 + $0x440] sm:$0xff] }
  0x73   :  { %1433 = vst [vmem:[#allocation6 + $0x3b8] sm:$0xff] %v1177_v57  ;;  %v1179_v9 = vadd.f32 %v923_v58, %v665_v54  ;;  %v1180_v10 = vadd.f32 %v924_v60, %v666_v59  ;;  %v926_v11 = vmul.f32 %v1673_v1, %v411_v55  ;;  %v669_v12 = vmul.f32 %v1671_v0, %v156_v56  ;;  %v423_v53 = vld [vmem:[%s2963_s2 + $0x440] sm:$0xff]  ;;  %v168_v54 = vld [vmem:[#allocation3 + $0x448] sm:$0xff]  ;;  %v169_v60 = vld [vmem:[#allocation3 + $0x450] sm:$0xff] }
  0x74   :  { %1434 = vst [vmem:[#allocation6 + $0x3c0] sm:$0xff] %v1178_v2  ;;  %v1181_v15 = vadd.f32 %v925_v4, %v667_v3  ;;  %v927_v16 = vmul.f32 %v1673_v1, %v412_v61  ;;  %v670_v17 = vmul.f32 %v1671_v0, %v157_v62  ;;  %v928_v18 = vmul.f32 %v1673_v1, %v413_v63  ;;  %v424_v59 = vld [vmem:[%s2963_s2 + $0x448] sm:$0xff]  ;;  %v425_v61 = vld [vmem:[%s2963_s2 + $0x450] sm:$0xff]  ;;  %v170_v4 = vld [vmem:[#allocation3 + $0x458] sm:$0xff] }
  0x75   :  { %1435 = vst [vmem:[#allocation6 + $0x3c8] sm:$0xff] %v1179_v9  ;;  %1436 = vst [vmem:[#allocation6 + $0x3d0] sm:$0xff] %v1180_v10  ;;  %v1182_v22 = vadd.f32 %v926_v11, %v668_v5  ;;  %v671_v23 = vmul.f32 %v1671_v0, %v158_v6  ;;  %v929_v24 = vmul.f32 %v1673_v1, %v414_v7  ;;  %v426_v5 = vld [vmem:[%s2963_s2 + $0x458] sm:$0xff]  ;;  %v171_v6 = vld [vmem:[#allocation3 + $0x460] sm:$0xff] }
  0x76   :  { %v672_v25 = vmul.f32 %v1671_v0, %v159_v8  ;;  %1437 = vst [vmem:[#allocation6 + $0x3d8] sm:$0xff] %v1181_v15  ;;  %v1183_v29 = vadd.f32 %v927_v16, %v669_v12  ;;  %v1184_v30 = vadd.f32 %v928_v18, %v670_v17  ;;  %v930_v31 = vmul.f32 %v1673_v1, %v415_v13  ;;  %v427_v11 = vld [vmem:[%s2963_s2 + $0x460] sm:$0xff]  ;;  %v172_v12 = vld [vmem:[#allocation3 + $0x468] sm:$0xff]  ;;  %v173_v18 = vld [vmem:[#allocation3 + $0x470] sm:$0xff] }
  0x77   :  { %v673_v32 = vmul.f32 %v1671_v0, %v160_v14  ;;  %1438 = vst [vmem:[#allocation6 + $0x3e0] sm:$0xff] %v1182_v22  ;;  %v1185_v35 = vadd.f32 %v929_v24, %v671_v23  ;;  %v931_v36 = vmul.f32 %v1673_v1, %v416_v19  ;;  %v674_v37 = vmul.f32 %v1671_v0, %v161_v20  ;;  %v428_v17 = vld [vmem:[%s2963_s2 + $0x468] sm:$0xff]  ;;  %v429_v19 = vld [vmem:[%s2963_s2 + $0x470] sm:$0xff]  ;;  %v174_v24 = vld [vmem:[#allocation3 + $0x478] sm:$0xff] }
  0x78   :  { %v932_v38 = vmul.f32 %v1673_v1, %v417_v21  ;;  %1439 = vst [vmem:[#allocation6 + $0x3e8] sm:$0xff] %v1183_v29  ;;  %1440 = vst [vmem:[#allocation6 + $0x3f0] sm:$0xff] %v1184_v30  ;;  %v1186_v42 = vadd.f32 %v930_v31, %v672_v25  ;;  %v675_v43 = vmul.f32 %v1671_v0, %v162_v26  ;;  %v430_v25 = vld [vmem:[%s2963_s2 + $0x478] sm:$0xff]  ;;  %v175_v26 = vld [vmem:[#allocation3 + $0x480] sm:$0xff] }
  0x79   :  { %v933_v44 = vmul.f32 %v1673_v1, %v418_v27  ;;  %v676_v45 = vmul.f32 %v1671_v0, %v163_v28  ;;  %1441 = vst [vmem:[#allocation6 + $0x3f8] sm:$0xff] %v1185_v35  ;;  %v1187_v49 = vadd.f32 %v931_v36, %v673_v32  ;;  %v934_v51 = vmul.f32 %v1673_v1, %v419_v33  ;;  %v431_v31 = vld [vmem:[%s2963_s2 + $0x480] sm:$0xff]  ;;  %v176_v32 = vld [vmem:[#allocation3 + $0x488] sm:$0xff] }
  0x7a   :  { %v1188_v50 = vadd.f32 %v932_v38, %v674_v37  ;;  %v677_v52 = vmul.f32 %v1671_v0, %v164_v34  ;;  %1442 = vst [vmem:[#allocation6 + $0x400] sm:$0xff] %v1186_v42  ;;  %v935_v56 = vmul.f32 %v1673_v1, %v420_v39  ;;  %v678_v57 = vmul.f32 %v1671_v0, %v165_v40  ;;  %v432_v37 = vld [vmem:[%s2963_s2 + $0x488] sm:$0xff]  ;;  %v177_v38 = vld [vmem:[#allocation3 + $0x490] sm:$0xff] }
  0x7b   :  { %v1189_v55 = vadd.f32 %v933_v44, %v675_v43  ;;  %v936_v58 = vmul.f32 %v1673_v1, %v421_v41  ;;  %1443 = vst [vmem:[#allocation6 + $0x408] sm:$0xff] %v1187_v49  ;;  %v1190_v62 = vadd.f32 %v934_v51, %v676_v45  ;;  %v679_v63 = vmul.f32 %v1671_v0, %v166_v46  ;;  %v433_v39 = vld [vmem:[%s2963_s2 + $0x490] sm:$0xff]  ;;  %v178_v44 = vld [vmem:[#allocation3 + $0x498] sm:$0xff]  ;;  %v179_v46 = vld [vmem:[#allocation3 + $0x4a0] sm:$0xff] }
  0x7c   :  { %1444 = vst [vmem:[#allocation6 + $0x410] sm:$0xff] %v1188_v50  ;;  %v937_v2 = vmul.f32 %v1673_v1, %v422_v47  ;;  %v680_v3 = vmul.f32 %v1671_v0, %v167_v48  ;;  %v1191_v7 = vadd.f32 %v935_v56, %v677_v52  ;;  %v938_v9 = vmul.f32 %v1673_v1, %v423_v53  ;;  %v434_v45 = vld [vmem:[%s2963_s2 + $0x498] sm:$0xff]  ;;  %v435_v51 = vld [vmem:[%s2963_s2 + $0x4a0] sm:$0xff]  ;;  %v180_v52 = vld [vmem:[#allocation3 + $0x4a8] sm:$0xff] }
  0x7d   :  { %1445 = vst [vmem:[#allocation6 + $0x418] sm:$0xff] %v1189_v55  ;;  %v1192_v8 = vadd.f32 %v936_v58, %v678_v57  ;;  %v681_v10 = vmul.f32 %v1671_v0, %v168_v54  ;;  %1446 = vst [vmem:[#allocation6 + $0x420] sm:$0xff] %v1190_v62  ;;  %v939_v14 = vmul.f32 %v1673_v1, %v424_v59  ;;  %v436_v57 = vld [vmem:[%s2963_s2 + $0x4a8] sm:$0xff]  ;;  %v181_v58 = vld [vmem:[#allocation3 + $0x4b0] sm:$0xff] }
  0x7e   :  { %v1193_v13 = vadd.f32 %v937_v2, %v679_v63  ;;  %v682_v15 = vmul.f32 %v1671_v0, %v169_v60  ;;  %v940_v16 = vmul.f32 %v1673_v1, %v425_v61  ;;  %1447 = vst [vmem:[#allocation6 + $0x428] sm:$0xff] %v1191_v7  ;;  %v1194_v20 = vadd.f32 %v938_v9, %v680_v3  ;;  %v437_v59 = vld [vmem:[%s2963_s2 + $0x4b0] sm:$0xff]  ;;  %v182_v2 = vld [vmem:[#allocation3 + $0x4b8] sm:$0xff]  ;;  %v439_v9 = vld [vmem:[%s2963_s2 + $0x4c0] sm:$0xff] }
  0x7f   :  { %1448 = vst [vmem:[#allocation6 + $0x430] sm:$0xff] %v1192_v8  ;;  %v683_v21 = vmul.f32 %v1671_v0, %v170_v4  ;;  %v941_v22 = vmul.f32 %v1673_v1, %v426_v5  ;;  %v684_v23 = vmul.f32 %v1671_v0, %v171_v6  ;;  %v1195_v27 = vadd.f32 %v939_v14, %v681_v10  ;;  %v438_v3 = vld [vmem:[%s2963_s2 + $0x4b8] sm:$0xff]  ;;  %v183_v4 = vld [vmem:[#allocation3 + $0x4c0] sm:$0xff]  ;;  %v184_v10 = vld [vmem:[#allocation3 + $0x4c8] sm:$0xff] }
  0x80   :  { %1449 = vst [vmem:[#allocation6 + $0x438] sm:$0xff] %v1193_v13  ;;  %v1196_v28 = vadd.f32 %v940_v16, %v682_v15  ;;  %v942_v29 = vmul.f32 %v1673_v1, %v427_v11  ;;  %v685_v30 = vmul.f32 %v1671_v0, %v172_v12  ;;  %1450 = vst [vmem:[#allocation6 + $0x440] sm:$0xff] %v1194_v20  ;;  %v440_v15 = vld [vmem:[%s2963_s2 + $0x4c8] sm:$0xff]  ;;  %v185_v16 = vld [vmem:[#allocation3 + $0x4d0] sm:$0xff] }
  0x81   :  { %v1197_v33 = vadd.f32 %v941_v22, %v683_v21  ;;  %v943_v34 = vmul.f32 %v1673_v1, %v428_v17  ;;  %v686_v35 = vmul.f32 %v1671_v0, %v173_v18  ;;  %v944_v36 = vmul.f32 %v1673_v1, %v429_v19  ;;  %1451 = vst [vmem:[#allocation6 + $0x448] sm:$0xff] %v1195_v27  ;;  %v441_v17 = vld [vmem:[%s2963_s2 + $0x4d0] sm:$0xff]  ;;  %v186_v22 = vld [vmem:[#allocation3 + $0x4d8] sm:$0xff] }
  0x82   :  { %1452 = vst [vmem:[#allocation6 + $0x450] sm:$0xff] %v1196_v28  ;;  %v1198_v40 = vadd.f32 %v942_v29, %v684_v23  ;;  %v687_v41 = vmul.f32 %v1671_v0, %v174_v24  ;;  %v945_v42 = vmul.f32 %v1673_v1, %v430_v25  ;;  %v688_v43 = vmul.f32 %v1671_v0, %v175_v26  ;;  %v442_v23 = vld [vmem:[%s2963_s2 + $0x4d8] sm:$0xff]  ;;  %v187_v24 = vld [vmem:[#allocation3 + $0x4e0] sm:$0xff] }
  0x83   :  { %1453 = vst [vmem:[#allocation6 + $0x458] sm:$0xff] %v1197_v33  ;;  %v1199_v47 = vadd.f32 %v943_v34, %v685_v30  ;;  %v1200_v48 = vadd.f32 %v944_v36, %v686_v35  ;;  %v946_v49 = vmul.f32 %v1673_v1, %v431_v31  ;;  %v689_v50 = vmul.f32 %v1671_v0, %v176_v32  ;;  %v443_v29 = vld [vmem:[%s2963_s2 + $0x4e0] sm:$0xff]  ;;  %v188_v30 = vld [vmem:[#allocation3 + $0x4e8] sm:$0xff]  ;;  %v189_v36 = vld [vmem:[#allocation3 + $0x4f0] sm:$0xff] }
  0x84   :  { %1454 = vst [vmem:[#allocation6 + $0x460] sm:$0xff] %v1198_v40  ;;  %v1201_v53 = vadd.f32 %v945_v42, %v687_v41  ;;  %v947_v54 = vmul.f32 %v1673_v1, %v432_v37  ;;  %v690_v55 = vmul.f32 %v1671_v0, %v177_v38  ;;  %v948_v56 = vmul.f32 %v1673_v1, %v433_v39  ;;  %v444_v35 = vld [vmem:[%s2963_s2 + $0x4e8] sm:$0xff]  ;;  %v445_v37 = vld [vmem:[%s2963_s2 + $0x4f0] sm:$0xff]  ;;  %v190_v42 = vld [vmem:[#allocation3 + $0x4f8] sm:$0xff] }
  0x85   :  { %1455 = vst [vmem:[#allocation6 + $0x468] sm:$0xff] %v1199_v47  ;;  %1456 = vst [vmem:[#allocation6 + $0x470] sm:$0xff] %v1200_v48  ;;  %v1202_v60 = vadd.f32 %v946_v49, %v688_v43  ;;  %v691_v61 = vmul.f32 %v1671_v0, %v178_v44  ;;  %v949_v62 = vmul.f32 %v1673_v1, %v434_v45  ;;  %v446_v43 = vld [vmem:[%s2963_s2 + $0x4f8] sm:$0xff]  ;;  %v191_v44 = vld [vmem:[#allocation3 + $0x500] sm:$0xff] }
  0x86   :  { %v692_v63 = vmul.f32 %v1671_v0, %v179_v46  ;;  %1457 = vst [vmem:[#allocation6 + $0x478] sm:$0xff] %v1201_v53  ;;  %v1203_v5 = vadd.f32 %v947_v54, %v689_v50  ;;  %v1204_v6 = vadd.f32 %v948_v56, %v690_v55  ;;  %v950_v7 = vmul.f32 %v1673_v1, %v435_v51  ;;  %v447_v49 = vld [vmem:[%s2963_s2 + $0x500] sm:$0xff]  ;;  %v192_v50 = vld [vmem:[#allocation3 + $0x508] sm:$0xff]  ;;  %v193_v56 = vld [vmem:[#allocation3 + $0x510] sm:$0xff] }
  0x87   :  { %v693_v8 = vmul.f32 %v1671_v0, %v180_v52  ;;  %1458 = vst [vmem:[#allocation6 + $0x480] sm:$0xff] %v1202_v60  ;;  %v1205_v11 = vadd.f32 %v949_v62, %v691_v61  ;;  %v951_v12 = vmul.f32 %v1673_v1, %v436_v57  ;;  %v694_v13 = vmul.f32 %v1671_v0, %v181_v58  ;;  %v448_v55 = vld [vmem:[%s2963_s2 + $0x508] sm:$0xff]  ;;  %v449_v57 = vld [vmem:[%s2963_s2 + $0x510] sm:$0xff]  ;;  %v194_v62 = vld [vmem:[#allocation3 + $0x518] sm:$0xff] }
  0x88   :  { %v952_v14 = vmul.f32 %v1673_v1, %v437_v59  ;;  %1459 = vst [vmem:[#allocation6 + $0x488] sm:$0xff] %v1203_v5  ;;  %1460 = vst [vmem:[#allocation6 + $0x490] sm:$0xff] %v1204_v6  ;;  %v1206_v18 = vadd.f32 %v950_v7, %v692_v63  ;;  %v695_v19 = vmul.f32 %v1671_v0, %v182_v2  ;;  %v450_v63 = vld [vmem:[%s2963_s2 + $0x518] sm:$0xff]  ;;  %v195_v2 = vld [vmem:[#allocation3 + $0x520] sm:$0xff] }
  0x89   :  { %v953_v20 = vmul.f32 %v1673_v1, %v438_v3  ;;  %v696_v21 = vmul.f32 %v1671_v0, %v183_v4  ;;  %1461 = vst [vmem:[#allocation6 + $0x498] sm:$0xff] %v1205_v11  ;;  %v1207_v25 = vadd.f32 %v951_v12, %v693_v8  ;;  %v954_v27 = vmul.f32 %v1673_v1, %v439_v9  ;;  %v451_v7 = vld [vmem:[%s2963_s2 + $0x520] sm:$0xff]  ;;  %v196_v8 = vld [vmem:[#allocation3 + $0x528] sm:$0xff] }
  0x8a   :  { %v1208_v26 = vadd.f32 %v952_v14, %v694_v13  ;;  %v697_v28 = vmul.f32 %v1671_v0, %v184_v10  ;;  %1462 = vst [vmem:[#allocation6 + $0x4a0] sm:$0xff] %v1206_v18  ;;  %v955_v32 = vmul.f32 %v1673_v1, %v440_v15  ;;  %v698_v33 = vmul.f32 %v1671_v0, %v185_v16  ;;  %v452_v13 = vld [vmem:[%s2963_s2 + $0x528] sm:$0xff]  ;;  %v197_v14 = vld [vmem:[#allocation3 + $0x530] sm:$0xff] }
  0x8b   :  { %v1209_v31 = vadd.f32 %v953_v20, %v695_v19  ;;  %v956_v34 = vmul.f32 %v1673_v1, %v441_v17  ;;  %1463 = vst [vmem:[#allocation6 + $0x4a8] sm:$0xff] %v1207_v25  ;;  %v1210_v38 = vadd.f32 %v954_v27, %v696_v21  ;;  %v699_v39 = vmul.f32 %v1671_v0, %v186_v22  ;;  %v453_v15 = vld [vmem:[%s2963_s2 + $0x530] sm:$0xff]  ;;  %v198_v20 = vld [vmem:[#allocation3 + $0x538] sm:$0xff]  ;;  %v199_v22 = vld [vmem:[#allocation3 + $0x540] sm:$0xff] }
  0x8c   :  { %1464 = vst [vmem:[#allocation6 + $0x4b0] sm:$0xff] %v1208_v26  ;;  %v957_v40 = vmul.f32 %v1673_v1, %v442_v23  ;;  %v700_v41 = vmul.f32 %v1671_v0, %v187_v24  ;;  %v1211_v45 = vadd.f32 %v955_v32, %v697_v28  ;;  %v958_v47 = vmul.f32 %v1673_v1, %v443_v29  ;;  %v454_v21 = vld [vmem:[%s2963_s2 + $0x538] sm:$0xff]  ;;  %v455_v27 = vld [vmem:[%s2963_s2 + $0x540] sm:$0xff]  ;;  %v200_v28 = vld [vmem:[#allocation3 + $0x548] sm:$0xff] }
  0x8d   :  { %1465 = vst [vmem:[#allocation6 + $0x4b8] sm:$0xff] %v1209_v31  ;;  %v1212_v46 = vadd.f32 %v956_v34, %v698_v33  ;;  %v701_v48 = vmul.f32 %v1671_v0, %v188_v30  ;;  %1466 = vst [vmem:[#allocation6 + $0x4c0] sm:$0xff] %v1210_v38  ;;  %v959_v52 = vmul.f32 %v1673_v1, %v444_v35  ;;  %v456_v33 = vld [vmem:[%s2963_s2 + $0x548] sm:$0xff]  ;;  %v201_v34 = vld [vmem:[#allocation3 + $0x550] sm:$0xff] }
  0x8e   :  { %v1213_v51 = vadd.f32 %v957_v40, %v699_v39  ;;  %v702_v53 = vmul.f32 %v1671_v0, %v189_v36  ;;  %v960_v54 = vmul.f32 %v1673_v1, %v445_v37  ;;  %1467 = vst [vmem:[#allocation6 + $0x4c8] sm:$0xff] %v1211_v45  ;;  %v1214_v58 = vadd.f32 %v958_v47, %v700_v41  ;;  %v457_v35 = vld [vmem:[%s2963_s2 + $0x550] sm:$0xff]  ;;  %v202_v40 = vld [vmem:[#allocation3 + $0x558] sm:$0xff]  ;;  %v459_v47 = vld [vmem:[%s2963_s2 + $0x560] sm:$0xff] }
  0x8f   :  { %1468 = vst [vmem:[#allocation6 + $0x4d0] sm:$0xff] %v1212_v46  ;;  %v703_v59 = vmul.f32 %v1671_v0, %v190_v42  ;;  %v961_v60 = vmul.f32 %v1673_v1, %v446_v43  ;;  %v704_v61 = vmul.f32 %v1671_v0, %v191_v44  ;;  %v1215_v3 = vadd.f32 %v959_v52, %v701_v48  ;;  %v458_v41 = vld [vmem:[%s2963_s2 + $0x558] sm:$0xff]  ;;  %v203_v42 = vld [vmem:[#allocation3 + $0x560] sm:$0xff]  ;;  %v204_v48 = vld [vmem:[#allocation3 + $0x568] sm:$0xff] }
  0x90   :  { %1469 = vst [vmem:[#allocation6 + $0x4d8] sm:$0xff] %v1213_v51  ;;  %v1216_v4 = vadd.f32 %v960_v54, %v702_v53  ;;  %v962_v5 = vmul.f32 %v1673_v1, %v447_v49  ;;  %v705_v6 = vmul.f32 %v1671_v0, %v192_v50  ;;  %1470 = vst [vmem:[#allocation6 + $0x4e0] sm:$0xff] %v1214_v58  ;;  %v460_v53 = vld [vmem:[%s2963_s2 + $0x568] sm:$0xff]  ;;  %v205_v54 = vld [vmem:[#allocation3 + $0x570] sm:$0xff] }
  0x91   :  { %v1217_v9 = vadd.f32 %v961_v60, %v703_v59  ;;  %v963_v10 = vmul.f32 %v1673_v1, %v448_v55  ;;  %v706_v11 = vmul.f32 %v1671_v0, %v193_v56  ;;  %v964_v12 = vmul.f32 %v1673_v1, %v449_v57  ;;  %1471 = vst [vmem:[#allocation6 + $0x4e8] sm:$0xff] %v1215_v3  ;;  %v461_v55 = vld [vmem:[%s2963_s2 + $0x570] sm:$0xff]  ;;  %v206_v60 = vld [vmem:[#allocation3 + $0x578] sm:$0xff] }
  0x92   :  { %1472 = vst [vmem:[#allocation6 + $0x4f0] sm:$0xff] %v1216_v4  ;;  %v1218_v16 = vadd.f32 %v962_v5, %v704_v61  ;;  %v707_v17 = vmul.f32 %v1671_v0, %v194_v62  ;;  %v965_v18 = vmul.f32 %v1673_v1, %v450_v63  ;;  %v708_v19 = vmul.f32 %v1671_v0, %v195_v2  ;;  %v462_v61 = vld [vmem:[%s2963_s2 + $0x578] sm:$0xff]  ;;  %v207_v62 = vld [vmem:[#allocation3 + $0x580] sm:$0xff] }
  0x93   :  { %1473 = vst [vmem:[#allocation6 + $0x4f8] sm:$0xff] %v1217_v9  ;;  %v1219_v23 = vadd.f32 %v963_v10, %v705_v6  ;;  %v1220_v24 = vadd.f32 %v964_v12, %v706_v11  ;;  %v966_v25 = vmul.f32 %v1673_v1, %v451_v7  ;;  %v709_v26 = vmul.f32 %v1671_v0, %v196_v8  ;;  %v463_v5 = vld [vmem:[%s2963_s2 + $0x580] sm:$0xff]  ;;  %v208_v6 = vld [vmem:[#allocation3 + $0x588] sm:$0xff]  ;;  %v209_v12 = vld [vmem:[#allocation3 + $0x590] sm:$0xff] }
  0x94   :  { %1474 = vst [vmem:[#allocation6 + $0x500] sm:$0xff] %v1218_v16  ;;  %v1221_v29 = vadd.f32 %v965_v18, %v707_v17  ;;  %v967_v30 = vmul.f32 %v1673_v1, %v452_v13  ;;  %v710_v31 = vmul.f32 %v1671_v0, %v197_v14  ;;  %v968_v32 = vmul.f32 %v1673_v1, %v453_v15  ;;  %v464_v11 = vld [vmem:[%s2963_s2 + $0x588] sm:$0xff]  ;;  %v465_v13 = vld [vmem:[%s2963_s2 + $0x590] sm:$0xff]  ;;  %v210_v18 = vld [vmem:[#allocation3 + $0x598] sm:$0xff] }
  0x95   :  { %1475 = vst [vmem:[#allocation6 + $0x508] sm:$0xff] %v1219_v23  ;;  %1476 = vst [vmem:[#allocation6 + $0x510] sm:$0xff] %v1220_v24  ;;  %v1222_v36 = vadd.f32 %v966_v25, %v708_v19  ;;  %v711_v37 = vmul.f32 %v1671_v0, %v198_v20  ;;  %v969_v38 = vmul.f32 %v1673_v1, %v454_v21  ;;  %v466_v19 = vld [vmem:[%s2963_s2 + $0x598] sm:$0xff]  ;;  %v211_v20 = vld [vmem:[#allocation3 + $0x5a0] sm:$0xff] }
  0x96   :  { %v712_v39 = vmul.f32 %v1671_v0, %v199_v22  ;;  %1477 = vst [vmem:[#allocation6 + $0x518] sm:$0xff] %v1221_v29  ;;  %v1223_v43 = vadd.f32 %v967_v30, %v709_v26  ;;  %v1224_v44 = vadd.f32 %v968_v32, %v710_v31  ;;  %v970_v45 = vmul.f32 %v1673_v1, %v455_v27  ;;  %v467_v25 = vld [vmem:[%s2963_s2 + $0x5a0] sm:$0xff]  ;;  %v212_v26 = vld [vmem:[#allocation3 + $0x5a8] sm:$0xff]  ;;  %v213_v32 = vld [vmem:[#allocation3 + $0x5b0] sm:$0xff] }
  0x97   :  { %v713_v46 = vmul.f32 %v1671_v0, %v200_v28  ;;  %1478 = vst [vmem:[#allocation6 + $0x520] sm:$0xff] %v1222_v36  ;;  %v1225_v49 = vadd.f32 %v969_v38, %v711_v37  ;;  %v971_v50 = vmul.f32 %v1673_v1, %v456_v33  ;;  %v714_v51 = vmul.f32 %v1671_v0, %v201_v34  ;;  %v468_v31 = vld [vmem:[%s2963_s2 + $0x5a8] sm:$0xff]  ;;  %v469_v33 = vld [vmem:[%s2963_s2 + $0x5b0] sm:$0xff]  ;;  %v214_v38 = vld [vmem:[#allocation3 + $0x5b8] sm:$0xff] }
  0x98   :  { %v972_v52 = vmul.f32 %v1673_v1, %v457_v35  ;;  %1479 = vst [vmem:[#allocation6 + $0x528] sm:$0xff] %v1223_v43  ;;  %1480 = vst [vmem:[#allocation6 + $0x530] sm:$0xff] %v1224_v44  ;;  %v1226_v56 = vadd.f32 %v970_v45, %v712_v39  ;;  %v715_v57 = vmul.f32 %v1671_v0, %v202_v40  ;;  %v470_v39 = vld [vmem:[%s2963_s2 + $0x5b8] sm:$0xff]  ;;  %v215_v40 = vld [vmem:[#allocation3 + $0x5c0] sm:$0xff] }
  0x99   :  { %v973_v58 = vmul.f32 %v1673_v1, %v458_v41  ;;  %v716_v59 = vmul.f32 %v1671_v0, %v203_v42  ;;  %1481 = vst [vmem:[#allocation6 + $0x538] sm:$0xff] %v1225_v49  ;;  %v1227_v63 = vadd.f32 %v971_v50, %v713_v46  ;;  %v974_v3 = vmul.f32 %v1673_v1, %v459_v47  ;;  %v471_v45 = vld [vmem:[%s2963_s2 + $0x5c0] sm:$0xff]  ;;  %v216_v46 = vld [vmem:[#allocation3 + $0x5c8] sm:$0xff] }
  0x9a   :  { %v1228_v2 = vadd.f32 %v972_v52, %v714_v51  ;;  %v717_v4 = vmul.f32 %v1671_v0, %v204_v48  ;;  %1482 = vst [vmem:[#allocation6 + $0x540] sm:$0xff] %v1226_v56  ;;  %v975_v8 = vmul.f32 %v1673_v1, %v460_v53  ;;  %v718_v9 = vmul.f32 %v1671_v0, %v205_v54  ;;  %v472_v51 = vld [vmem:[%s2963_s2 + $0x5c8] sm:$0xff]  ;;  %v217_v52 = vld [vmem:[#allocation3 + $0x5d0] sm:$0xff] }
  0x9b   :  { %v1229_v7 = vadd.f32 %v973_v58, %v715_v57  ;;  %v976_v10 = vmul.f32 %v1673_v1, %v461_v55  ;;  %1483 = vst [vmem:[#allocation6 + $0x548] sm:$0xff] %v1227_v63  ;;  %v1230_v14 = vadd.f32 %v974_v3, %v716_v59  ;;  %v719_v15 = vmul.f32 %v1671_v0, %v206_v60  ;;  %v473_v53 = vld [vmem:[%s2963_s2 + $0x5d0] sm:$0xff]  ;;  %v218_v58 = vld [vmem:[#allocation3 + $0x5d8] sm:$0xff]  ;;  %v219_v60 = vld [vmem:[#allocation3 + $0x5e0] sm:$0xff] }
  0x9c   :  { %1484 = vst [vmem:[#allocation6 + $0x550] sm:$0xff] %v1228_v2  ;;  %v977_v16 = vmul.f32 %v1673_v1, %v462_v61  ;;  %v720_v17 = vmul.f32 %v1671_v0, %v207_v62  ;;  %v1231_v21 = vadd.f32 %v975_v8, %v717_v4  ;;  %v978_v23 = vmul.f32 %v1673_v1, %v463_v5  ;;  %v474_v59 = vld [vmem:[%s2963_s2 + $0x5d8] sm:$0xff]  ;;  %v475_v3 = vld [vmem:[%s2963_s2 + $0x5e0] sm:$0xff]  ;;  %v220_v4 = vld [vmem:[#allocation3 + $0x5e8] sm:$0xff] }
  0x9d   :  { %1485 = vst [vmem:[#allocation6 + $0x558] sm:$0xff] %v1229_v7  ;;  %v1232_v22 = vadd.f32 %v976_v10, %v718_v9  ;;  %v721_v24 = vmul.f32 %v1671_v0, %v208_v6  ;;  %1486 = vst [vmem:[#allocation6 + $0x560] sm:$0xff] %v1230_v14  ;;  %v979_v28 = vmul.f32 %v1673_v1, %v464_v11  ;;  %v476_v9 = vld [vmem:[%s2963_s2 + $0x5e8] sm:$0xff]  ;;  %v221_v10 = vld [vmem:[#allocation3 + $0x5f0] sm:$0xff] }
  0x9e   :  { %v1233_v27 = vadd.f32 %v977_v16, %v719_v15  ;;  %v722_v29 = vmul.f32 %v1671_v0, %v209_v12  ;;  %v980_v30 = vmul.f32 %v1673_v1, %v465_v13  ;;  %1487 = vst [vmem:[#allocation6 + $0x568] sm:$0xff] %v1231_v21  ;;  %v1234_v34 = vadd.f32 %v978_v23, %v720_v17  ;;  %v477_v11 = vld [vmem:[%s2963_s2 + $0x5f0] sm:$0xff]  ;;  %v222_v16 = vld [vmem:[#allocation3 + $0x5f8] sm:$0xff]  ;;  %v479_v23 = vld [vmem:[%s2963_s2 + $0x600] sm:$0xff] }
  0x9f   :  { %1488 = vst [vmem:[#allocation6 + $0x570] sm:$0xff] %v1232_v22  ;;  %v723_v35 = vmul.f32 %v1671_v0, %v210_v18  ;;  %v981_v36 = vmul.f32 %v1673_v1, %v466_v19  ;;  %v724_v37 = vmul.f32 %v1671_v0, %v211_v20  ;;  %v1235_v41 = vadd.f32 %v979_v28, %v721_v24  ;;  %v478_v17 = vld [vmem:[%s2963_s2 + $0x5f8] sm:$0xff]  ;;  %v223_v18 = vld [vmem:[#allocation3 + $0x600] sm:$0xff]  ;;  %v224_v24 = vld [vmem:[#allocation3 + $0x608] sm:$0xff] }
  0xa0   :  { %1489 = vst [vmem:[#allocation6 + $0x578] sm:$0xff] %v1233_v27  ;;  %v1236_v42 = vadd.f32 %v980_v30, %v722_v29  ;;  %v982_v43 = vmul.f32 %v1673_v1, %v467_v25  ;;  %v725_v44 = vmul.f32 %v1671_v0, %v212_v26  ;;  %1490 = vst [vmem:[#allocation6 + $0x580] sm:$0xff] %v1234_v34  ;;  %v480_v29 = vld [vmem:[%s2963_s2 + $0x608] sm:$0xff]  ;;  %v225_v30 = vld [vmem:[#allocation3 + $0x610] sm:$0xff] }
  0xa1   :  { %v1237_v47 = vadd.f32 %v981_v36, %v723_v35  ;;  %v983_v48 = vmul.f32 %v1673_v1, %v468_v31  ;;  %v726_v49 = vmul.f32 %v1671_v0, %v213_v32  ;;  %v984_v50 = vmul.f32 %v1673_v1, %v469_v33  ;;  %1491 = vst [vmem:[#allocation6 + $0x588] sm:$0xff] %v1235_v41  ;;  %v481_v31 = vld [vmem:[%s2963_s2 + $0x610] sm:$0xff]  ;;  %v226_v36 = vld [vmem:[#allocation3 + $0x618] sm:$0xff] }
  0xa2   :  { %1492 = vst [vmem:[#allocation6 + $0x590] sm:$0xff] %v1236_v42  ;;  %v1238_v54 = vadd.f32 %v982_v43, %v724_v37  ;;  %v727_v55 = vmul.f32 %v1671_v0, %v214_v38  ;;  %v985_v56 = vmul.f32 %v1673_v1, %v470_v39  ;;  %v728_v57 = vmul.f32 %v1671_v0, %v215_v40  ;;  %v482_v37 = vld [vmem:[%s2963_s2 + $0x618] sm:$0xff]  ;;  %v227_v38 = vld [vmem:[#allocation3 + $0x620] sm:$0xff] }
  0xa3   :  { %1493 = vst [vmem:[#allocation6 + $0x598] sm:$0xff] %v1237_v47  ;;  %v1239_v61 = vadd.f32 %v983_v48, %v725_v44  ;;  %v1240_v62 = vadd.f32 %v984_v50, %v726_v49  ;;  %v986_v63 = vmul.f32 %v1673_v1, %v471_v45  ;;  %v729_v2 = vmul.f32 %v1671_v0, %v216_v46  ;;  %v483_v43 = vld [vmem:[%s2963_s2 + $0x620] sm:$0xff]  ;;  %v228_v44 = vld [vmem:[#allocation3 + $0x628] sm:$0xff]  ;;  %v229_v50 = vld [vmem:[#allocation3 + $0x630] sm:$0xff] }
  0xa4   :  { %1494 = vst [vmem:[#allocation6 + $0x5a0] sm:$0xff] %v1238_v54  ;;  %v1241_v5 = vadd.f32 %v985_v56, %v727_v55  ;;  %v987_v6 = vmul.f32 %v1673_v1, %v472_v51  ;;  %v730_v7 = vmul.f32 %v1671_v0, %v217_v52  ;;  %v988_v8 = vmul.f32 %v1673_v1, %v473_v53  ;;  %v484_v49 = vld [vmem:[%s2963_s2 + $0x628] sm:$0xff]  ;;  %v485_v51 = vld [vmem:[%s2963_s2 + $0x630] sm:$0xff]  ;;  %v230_v56 = vld [vmem:[#allocation3 + $0x638] sm:$0xff] }
  0xa5   :  { %1495 = vst [vmem:[#allocation6 + $0x5a8] sm:$0xff] %v1239_v61  ;;  %1496 = vst [vmem:[#allocation6 + $0x5b0] sm:$0xff] %v1240_v62  ;;  %v1242_v12 = vadd.f32 %v986_v63, %v728_v57  ;;  %v731_v13 = vmul.f32 %v1671_v0, %v218_v58  ;;  %v989_v14 = vmul.f32 %v1673_v1, %v474_v59  ;;  %v486_v57 = vld [vmem:[%s2963_s2 + $0x638] sm:$0xff]  ;;  %v231_v58 = vld [vmem:[#allocation3 + $0x640] sm:$0xff] }
  0xa6   :  { %v732_v15 = vmul.f32 %v1671_v0, %v219_v60  ;;  %1497 = vst [vmem:[#allocation6 + $0x5b8] sm:$0xff] %v1241_v5  ;;  %v1243_v19 = vadd.f32 %v987_v6, %v729_v2  ;;  %v1244_v20 = vadd.f32 %v988_v8, %v730_v7  ;;  %v990_v21 = vmul.f32 %v1673_v1, %v475_v3  ;;  %v487_v63 = vld [vmem:[%s2963_s2 + $0x640] sm:$0xff]  ;;  %v232_v2 = vld [vmem:[#allocation3 + $0x648] sm:$0xff]  ;;  %v233_v8 = vld [vmem:[#allocation3 + $0x650] sm:$0xff] }
  0xa7   :  { %v733_v22 = vmul.f32 %v1671_v0, %v220_v4  ;;  %1498 = vst [vmem:[#allocation6 + $0x5c0] sm:$0xff] %v1242_v12  ;;  %v1245_v25 = vadd.f32 %v989_v14, %v731_v13  ;;  %v991_v26 = vmul.f32 %v1673_v1, %v476_v9  ;;  %v734_v27 = vmul.f32 %v1671_v0, %v221_v10  ;;  %v488_v7 = vld [vmem:[%s2963_s2 + $0x648] sm:$0xff]  ;;  %v489_v9 = vld [vmem:[%s2963_s2 + $0x650] sm:$0xff]  ;;  %v234_v14 = vld [vmem:[#allocation3 + $0x658] sm:$0xff] }
  0xa8   :  { %v992_v28 = vmul.f32 %v1673_v1, %v477_v11  ;;  %1499 = vst [vmem:[#allocation6 + $0x5c8] sm:$0xff] %v1243_v19  ;;  %1500 = vst [vmem:[#allocation6 + $0x5d0] sm:$0xff] %v1244_v20  ;;  %v1246_v32 = vadd.f32 %v990_v21, %v732_v15  ;;  %v735_v33 = vmul.f32 %v1671_v0, %v222_v16  ;;  %v490_v15 = vld [vmem:[%s2963_s2 + $0x658] sm:$0xff]  ;;  %v235_v16 = vld [vmem:[#allocation3 + $0x660] sm:$0xff] }
  0xa9   :  { %v993_v34 = vmul.f32 %v1673_v1, %v478_v17  ;;  %v736_v35 = vmul.f32 %v1671_v0, %v223_v18  ;;  %1501 = vst [vmem:[#allocation6 + $0x5d8] sm:$0xff] %v1245_v25  ;;  %v1247_v39 = vadd.f32 %v991_v26, %v733_v22  ;;  %v994_v41 = vmul.f32 %v1673_v1, %v479_v23  ;;  %v491_v21 = vld [vmem:[%s2963_s2 + $0x660] sm:$0xff]  ;;  %v236_v22 = vld [vmem:[#allocation3 + $0x668] sm:$0xff] }
  0xaa   :  { %v1248_v40 = vadd.f32 %v992_v28, %v734_v27  ;;  %v737_v42 = vmul.f32 %v1671_v0, %v224_v24  ;;  %1502 = vst [vmem:[#allocation6 + $0x5e0] sm:$0xff] %v1246_v32  ;;  %v995_v46 = vmul.f32 %v1673_v1, %v480_v29  ;;  %v738_v47 = vmul.f32 %v1671_v0, %v225_v30  ;;  %v492_v27 = vld [vmem:[%s2963_s2 + $0x668] sm:$0xff]  ;;  %v237_v28 = vld [vmem:[#allocation3 + $0x670] sm:$0xff] }
  0xab   :  { %v1249_v45 = vadd.f32 %v993_v34, %v735_v33  ;;  %v996_v48 = vmul.f32 %v1673_v1, %v481_v31  ;;  %1503 = vst [vmem:[#allocation6 + $0x5e8] sm:$0xff] %v1247_v39  ;;  %v1250_v52 = vadd.f32 %v994_v41, %v736_v35  ;;  %v739_v53 = vmul.f32 %v1671_v0, %v226_v36  ;;  %v493_v29 = vld [vmem:[%s2963_s2 + $0x670] sm:$0xff]  ;;  %v238_v34 = vld [vmem:[#allocation3 + $0x678] sm:$0xff]  ;;  %v239_v36 = vld [vmem:[#allocation3 + $0x680] sm:$0xff] }
  0xac   :  { %1504 = vst [vmem:[#allocation6 + $0x5f0] sm:$0xff] %v1248_v40  ;;  %v997_v54 = vmul.f32 %v1673_v1, %v482_v37  ;;  %v740_v55 = vmul.f32 %v1671_v0, %v227_v38  ;;  %v1251_v59 = vadd.f32 %v995_v46, %v737_v42  ;;  %v998_v61 = vmul.f32 %v1673_v1, %v483_v43  ;;  %v494_v35 = vld [vmem:[%s2963_s2 + $0x678] sm:$0xff]  ;;  %v495_v41 = vld [vmem:[%s2963_s2 + $0x680] sm:$0xff]  ;;  %v240_v42 = vld [vmem:[#allocation3 + $0x688] sm:$0xff] }
  0xad   :  { %1505 = vst [vmem:[#allocation6 + $0x5f8] sm:$0xff] %v1249_v45  ;;  %v1252_v60 = vadd.f32 %v996_v48, %v738_v47  ;;  %v741_v62 = vmul.f32 %v1671_v0, %v228_v44  ;;  %1506 = vst [vmem:[#allocation6 + $0x600] sm:$0xff] %v1250_v52  ;;  %v999_v4 = vmul.f32 %v1673_v1, %v484_v49  ;;  %v496_v47 = vld [vmem:[%s2963_s2 + $0x688] sm:$0xff]  ;;  %v241_v48 = vld [vmem:[#allocation3 + $0x690] sm:$0xff] }
  0xae   :  { %v1253_v3 = vadd.f32 %v997_v54, %v739_v53  ;;  %v742_v5 = vmul.f32 %v1671_v0, %v229_v50  ;;  %v1000_v6 = vmul.f32 %v1673_v1, %v485_v51  ;;  %1507 = vst [vmem:[#allocation6 + $0x608] sm:$0xff] %v1251_v59  ;;  %v1254_v10 = vadd.f32 %v998_v61, %v740_v55  ;;  %v497_v49 = vld [vmem:[%s2963_s2 + $0x690] sm:$0xff]  ;;  %v242_v54 = vld [vmem:[#allocation3 + $0x698] sm:$0xff]  ;;  %v499_v61 = vld [vmem:[%s2963_s2 + $0x6a0] sm:$0xff] }
  0xaf   :  { %1508 = vst [vmem:[#allocation6 + $0x610] sm:$0xff] %v1252_v60  ;;  %v743_v11 = vmul.f32 %v1671_v0, %v230_v56  ;;  %v1001_v12 = vmul.f32 %v1673_v1, %v486_v57  ;;  %v744_v13 = vmul.f32 %v1671_v0, %v231_v58  ;;  %v1255_v17 = vadd.f32 %v999_v4, %v741_v62  ;;  %v498_v55 = vld [vmem:[%s2963_s2 + $0x698] sm:$0xff]  ;;  %v243_v56 = vld [vmem:[#allocation3 + $0x6a0] sm:$0xff]  ;;  %v244_v62 = vld [vmem:[#allocation3 + $0x6a8] sm:$0xff] }
  0xb0   :  { %1509 = vst [vmem:[#allocation6 + $0x618] sm:$0xff] %v1253_v3  ;;  %v1256_v18 = vadd.f32 %v1000_v6, %v742_v5  ;;  %v1002_v19 = vmul.f32 %v1673_v1, %v487_v63  ;;  %v745_v20 = vmul.f32 %v1671_v0, %v232_v2  ;;  %1510 = vst [vmem:[#allocation6 + $0x620] sm:$0xff] %v1254_v10  ;;  %v500_v5 = vld [vmem:[%s2963_s2 + $0x6a8] sm:$0xff]  ;;  %v245_v6 = vld [vmem:[#allocation3 + $0x6b0] sm:$0xff] }
  0xb1   :  { %v1257_v23 = vadd.f32 %v1001_v12, %v743_v11  ;;  %v1003_v24 = vmul.f32 %v1673_v1, %v488_v7  ;;  %v746_v25 = vmul.f32 %v1671_v0, %v233_v8  ;;  %v1004_v26 = vmul.f32 %v1673_v1, %v489_v9  ;;  %1511 = vst [vmem:[#allocation6 + $0x628] sm:$0xff] %v1255_v17  ;;  %v501_v7 = vld [vmem:[%s2963_s2 + $0x6b0] sm:$0xff]  ;;  %v246_v12 = vld [vmem:[#allocation3 + $0x6b8] sm:$0xff] }
  0xb2   :  { %1512 = vst [vmem:[#allocation6 + $0x630] sm:$0xff] %v1256_v18  ;;  %v1258_v30 = vadd.f32 %v1002_v19, %v744_v13  ;;  %v747_v31 = vmul.f32 %v1671_v0, %v234_v14  ;;  %v1005_v32 = vmul.f32 %v1673_v1, %v490_v15  ;;  %v748_v33 = vmul.f32 %v1671_v0, %v235_v16  ;;  %v502_v13 = vld [vmem:[%s2963_s2 + $0x6b8] sm:$0xff]  ;;  %v247_v14 = vld [vmem:[#allocation3 + $0x6c0] sm:$0xff] }
  0xb3   :  { %1513 = vst [vmem:[#allocation6 + $0x638] sm:$0xff] %v1257_v23  ;;  %v1259_v37 = vadd.f32 %v1003_v24, %v745_v20  ;;  %v1260_v38 = vadd.f32 %v1004_v26, %v746_v25  ;;  %v1006_v39 = vmul.f32 %v1673_v1, %v491_v21  ;;  %v749_v40 = vmul.f32 %v1671_v0, %v236_v22  ;;  %v503_v19 = vld [vmem:[%s2963_s2 + $0x6c0] sm:$0xff]  ;;  %v248_v20 = vld [vmem:[#allocation3 + $0x6c8] sm:$0xff]  ;;  %v249_v26 = vld [vmem:[#allocation3 + $0x6d0] sm:$0xff] }
  0xb4   :  { %1514 = vst [vmem:[#allocation6 + $0x640] sm:$0xff] %v1258_v30  ;;  %v1261_v43 = vadd.f32 %v1005_v32, %v747_v31  ;;  %v1007_v44 = vmul.f32 %v1673_v1, %v492_v27  ;;  %v750_v45 = vmul.f32 %v1671_v0, %v237_v28  ;;  %v1008_v46 = vmul.f32 %v1673_v1, %v493_v29  ;;  %v504_v25 = vld [vmem:[%s2963_s2 + $0x6c8] sm:$0xff]  ;;  %v505_v27 = vld [vmem:[%s2963_s2 + $0x6d0] sm:$0xff]  ;;  %v250_v32 = vld [vmem:[#allocation3 + $0x6d8] sm:$0xff] }
  0xb5   :  { %1515 = vst [vmem:[#allocation6 + $0x648] sm:$0xff] %v1259_v37  ;;  %1516 = vst [vmem:[#allocation6 + $0x650] sm:$0xff] %v1260_v38  ;;  %v1262_v50 = vadd.f32 %v1006_v39, %v748_v33  ;;  %v751_v51 = vmul.f32 %v1671_v0, %v238_v34  ;;  %v1009_v52 = vmul.f32 %v1673_v1, %v494_v35  ;;  %v506_v33 = vld [vmem:[%s2963_s2 + $0x6d8] sm:$0xff]  ;;  %v251_v34 = vld [vmem:[#allocation3 + $0x6e0] sm:$0xff] }
  0xb6   :  { %v752_v53 = vmul.f32 %v1671_v0, %v239_v36  ;;  %1517 = vst [vmem:[#allocation6 + $0x658] sm:$0xff] %v1261_v43  ;;  %v1263_v57 = vadd.f32 %v1007_v44, %v749_v40  ;;  %v1264_v58 = vadd.f32 %v1008_v46, %v750_v45  ;;  %v1010_v59 = vmul.f32 %v1673_v1, %v495_v41  ;;  %v507_v39 = vld [vmem:[%s2963_s2 + $0x6e0] sm:$0xff]  ;;  %v252_v40 = vld [vmem:[#allocation3 + $0x6e8] sm:$0xff]  ;;  %v253_v46 = vld [vmem:[#allocation3 + $0x6f0] sm:$0xff] }
  0xb7   :  { %v753_v60 = vmul.f32 %v1671_v0, %v240_v42  ;;  %1518 = vst [vmem:[#allocation6 + $0x660] sm:$0xff] %v1262_v50  ;;  %v1265_v63 = vadd.f32 %v1009_v52, %v751_v51  ;;  %v1011_v2 = vmul.f32 %v1673_v1, %v496_v47  ;;  %v754_v3 = vmul.f32 %v1671_v0, %v241_v48  ;;  %v508_v45 = vld [vmem:[%s2963_s2 + $0x6e8] sm:$0xff]  ;;  %v509_v47 = vld [vmem:[%s2963_s2 + $0x6f0] sm:$0xff]  ;;  %v254_v52 = vld [vmem:[#allocation3 + $0x6f8] sm:$0xff] }
  0xb8   :  { %v1012_v4 = vmul.f32 %v1673_v1, %v497_v49  ;;  %1519 = vst [vmem:[#allocation6 + $0x668] sm:$0xff] %v1263_v57  ;;  %1520 = vst [vmem:[#allocation6 + $0x670] sm:$0xff] %v1264_v58  ;;  %v1266_v8 = vadd.f32 %v1010_v59, %v752_v53  ;;  %v755_v9 = vmul.f32 %v1671_v0, %v242_v54  ;;  %v510_v53 = vld [vmem:[%s2963_s2 + $0x6f8] sm:$0xff]  ;;  %v255_v54 = vld [vmem:[#allocation3 + $0x700] sm:$0xff] }
  0xb9   :  { %v1013_v10 = vmul.f32 %v1673_v1, %v498_v55  ;;  %v756_v11 = vmul.f32 %v1671_v0, %v243_v56  ;;  %1521 = vst [vmem:[#allocation6 + $0x678] sm:$0xff] %v1265_v63  ;;  %v1267_v15 = vadd.f32 %v1011_v2, %v753_v60  ;;  %v1014_v17 = vmul.f32 %v1673_v1, %v499_v61  ;;  %v511_v59 = vld [vmem:[%s2963_s2 + $0x700] sm:$0xff]  ;;  %v256_v60 = vld [vmem:[#allocation3 + $0x708] sm:$0xff] }
  0xba   :  { %v1268_v16 = vadd.f32 %v1012_v4, %v754_v3  ;;  %v757_v18 = vmul.f32 %v1671_v0, %v244_v62  ;;  %1522 = vst [vmem:[#allocation6 + $0x680] sm:$0xff] %v1266_v8  ;;  %v1015_v22 = vmul.f32 %v1673_v1, %v500_v5  ;;  %v758_v23 = vmul.f32 %v1671_v0, %v245_v6  ;;  %v512_v3 = vld [vmem:[%s2963_s2 + $0x708] sm:$0xff]  ;;  %v257_v4 = vld [vmem:[#allocation3 + $0x710] sm:$0xff] }
  0xbb   :  { %v1269_v21 = vadd.f32 %v1013_v10, %v755_v9  ;;  %v1016_v24 = vmul.f32 %v1673_v1, %v501_v7  ;;  %1523 = vst [vmem:[#allocation6 + $0x688] sm:$0xff] %v1267_v15  ;;  %v1270_v28 = vadd.f32 %v1014_v17, %v756_v11  ;;  %v759_v29 = vmul.f32 %v1671_v0, %v246_v12  ;;  %v513_v5 = vld [vmem:[%s2963_s2 + $0x710] sm:$0xff]  ;;  %v258_v10 = vld [vmem:[#allocation3 + $0x718] sm:$0xff]  ;;  %v259_v12 = vld [vmem:[#allocation3 + $0x720] sm:$0xff] }
  0xbc   :  { %1524 = vst [vmem:[#allocation6 + $0x690] sm:$0xff] %v1268_v16  ;;  %v1017_v30 = vmul.f32 %v1673_v1, %v502_v13  ;;  %v760_v31 = vmul.f32 %v1671_v0, %v247_v14  ;;  %v1271_v35 = vadd.f32 %v1015_v22, %v757_v18  ;;  %v1018_v37 = vmul.f32 %v1673_v1, %v503_v19  ;;  %v514_v11 = vld [vmem:[%s2963_s2 + $0x718] sm:$0xff]  ;;  %v515_v17 = vld [vmem:[%s2963_s2 + $0x720] sm:$0xff]  ;;  %v260_v18 = vld [vmem:[#allocation3 + $0x728] sm:$0xff] }
  0xbd   :  { %1525 = vst [vmem:[#allocation6 + $0x698] sm:$0xff] %v1269_v21  ;;  %v1272_v36 = vadd.f32 %v1016_v24, %v758_v23  ;;  %v761_v38 = vmul.f32 %v1671_v0, %v248_v20  ;;  %1526 = vst [vmem:[#allocation6 + $0x6a0] sm:$0xff] %v1270_v28  ;;  %v1019_v42 = vmul.f32 %v1673_v1, %v504_v25  ;;  %v516_v23 = vld [vmem:[%s2963_s2 + $0x728] sm:$0xff]  ;;  %v261_v24 = vld [vmem:[#allocation3 + $0x730] sm:$0xff] }
  0xbe   :  { %v1273_v41 = vadd.f32 %v1017_v30, %v759_v29  ;;  %v762_v43 = vmul.f32 %v1671_v0, %v249_v26  ;;  %v1020_v44 = vmul.f32 %v1673_v1, %v505_v27  ;;  %1527 = vst [vmem:[#allocation6 + $0x6a8] sm:$0xff] %v1271_v35  ;;  %v1274_v48 = vadd.f32 %v1018_v37, %v760_v31  ;;  %v517_v25 = vld [vmem:[%s2963_s2 + $0x730] sm:$0xff]  ;;  %v262_v30 = vld [vmem:[#allocation3 + $0x738] sm:$0xff]  ;;  %v519_v37 = vld [vmem:[%s2963_s2 + $0x740] sm:$0xff] }
  0xbf   :  { %1528 = vst [vmem:[#allocation6 + $0x6b0] sm:$0xff] %v1272_v36  ;;  %v763_v49 = vmul.f32 %v1671_v0, %v250_v32  ;;  %v1021_v50 = vmul.f32 %v1673_v1, %v506_v33  ;;  %v764_v51 = vmul.f32 %v1671_v0, %v251_v34  ;;  %v1275_v55 = vadd.f32 %v1019_v42, %v761_v38  ;;  %v518_v31 = vld [vmem:[%s2963_s2 + $0x738] sm:$0xff]  ;;  %v263_v32 = vld [vmem:[#allocation3 + $0x740] sm:$0xff]  ;;  %v264_v38 = vld [vmem:[#allocation3 + $0x748] sm:$0xff] }
  0xc0   :  { %1529 = vst [vmem:[#allocation6 + $0x6b8] sm:$0xff] %v1273_v41  ;;  %v1276_v56 = vadd.f32 %v1020_v44, %v762_v43  ;;  %v1022_v57 = vmul.f32 %v1673_v1, %v507_v39  ;;  %v765_v58 = vmul.f32 %v1671_v0, %v252_v40  ;;  %1530 = vst [vmem:[#allocation6 + $0x6c0] sm:$0xff] %v1274_v48  ;;  %v520_v43 = vld [vmem:[%s2963_s2 + $0x748] sm:$0xff]  ;;  %v265_v44 = vld [vmem:[#allocation3 + $0x750] sm:$0xff] }
  0xc1   :  { %v1277_v61 = vadd.f32 %v1021_v50, %v763_v49  ;;  %v1023_v62 = vmul.f32 %v1673_v1, %v508_v45  ;;  %v766_v63 = vmul.f32 %v1671_v0, %v253_v46  ;;  %v1024_v2 = vmul.f32 %v1673_v1, %v509_v47  ;;  %1531 = vst [vmem:[#allocation6 + $0x6c8] sm:$0xff] %v1275_v55  ;;  %v521_v45 = vld [vmem:[%s2963_s2 + $0x750] sm:$0xff]  ;;  %v266_v50 = vld [vmem:[#allocation3 + $0x758] sm:$0xff] }
  0xc2   :  { %1532 = vst [vmem:[#allocation6 + $0x6d0] sm:$0xff] %v1276_v56  ;;  %v1278_v6 = vadd.f32 %v1022_v57, %v764_v51  ;;  %v767_v7 = vmul.f32 %v1671_v0, %v254_v52  ;;  %v1025_v8 = vmul.f32 %v1673_v1, %v510_v53  ;;  %v768_v9 = vmul.f32 %v1671_v0, %v255_v54  ;;  %v522_v51 = vld [vmem:[%s2963_s2 + $0x758] sm:$0xff]  ;;  %v267_v52 = vld [vmem:[#allocation3 + $0x760] sm:$0xff] }
  0xc3   :  { %1533 = vst [vmem:[#allocation6 + $0x6d8] sm:$0xff] %v1277_v61  ;;  %v1279_v13 = vadd.f32 %v1023_v62, %v765_v58  ;;  %v1280_v14 = vadd.f32 %v1024_v2, %v766_v63  ;;  %v1026_v15 = vmul.f32 %v1673_v1, %v511_v59  ;;  %v769_v16 = vmul.f32 %v1671_v0, %v256_v60  ;;  %v523_v57 = vld [vmem:[%s2963_s2 + $0x760] sm:$0xff]  ;;  %v268_v58 = vld [vmem:[#allocation3 + $0x768] sm:$0xff]  ;;  %v269_v2 = vld [vmem:[#allocation3 + $0x770] sm:$0xff] }
  0xc4   :  { %1534 = vst [vmem:[#allocation6 + $0x6e0] sm:$0xff] %v1278_v6  ;;  %v1281_v19 = vadd.f32 %v1025_v8, %v767_v7  ;;  %v1027_v20 = vmul.f32 %v1673_v1, %v512_v3  ;;  %v770_v21 = vmul.f32 %v1671_v0, %v257_v4  ;;  %v1028_v22 = vmul.f32 %v1673_v1, %v513_v5  ;;  %v524_v63 = vld [vmem:[%s2963_s2 + $0x768] sm:$0xff]  ;;  %v525_v3 = vld [vmem:[%s2963_s2 + $0x770] sm:$0xff]  ;;  %v270_v8 = vld [vmem:[#allocation3 + $0x778] sm:$0xff] }
  0xc5   :  { %1535 = vst [vmem:[#allocation6 + $0x6e8] sm:$0xff] %v1279_v13  ;;  %1536 = vst [vmem:[#allocation6 + $0x6f0] sm:$0xff] %v1280_v14  ;;  %v1282_v26 = vadd.f32 %v1026_v15, %v768_v9  ;;  %v771_v27 = vmul.f32 %v1671_v0, %v258_v10  ;;  %v1029_v28 = vmul.f32 %v1673_v1, %v514_v11  ;;  %v526_v9 = vld [vmem:[%s2963_s2 + $0x778] sm:$0xff]  ;;  %v271_v10 = vld [vmem:[#allocation3 + $0x780] sm:$0xff] }
  0xc6   :  { %v772_v29 = vmul.f32 %v1671_v0, %v259_v12  ;;  %1537 = vst [vmem:[#allocation6 + $0x6f8] sm:$0xff] %v1281_v19  ;;  %v1283_v33 = vadd.f32 %v1027_v20, %v769_v16  ;;  %v1284_v34 = vadd.f32 %v1028_v22, %v770_v21  ;;  %v1030_v35 = vmul.f32 %v1673_v1, %v515_v17  ;;  %v527_v15 = vld [vmem:[%s2963_s2 + $0x780] sm:$0xff]  ;;  %v272_v16 = vld [vmem:[#allocation3 + $0x788] sm:$0xff]  ;;  %v273_v22 = vld [vmem:[#allocation3 + $0x790] sm:$0xff] }
  0xc7   :  { %v773_v36 = vmul.f32 %v1671_v0, %v260_v18  ;;  %1538 = vst [vmem:[#allocation6 + $0x700] sm:$0xff] %v1282_v26  ;;  %v1285_v39 = vadd.f32 %v1029_v28, %v771_v27  ;;  %v1031_v40 = vmul.f32 %v1673_v1, %v516_v23  ;;  %v774_v41 = vmul.f32 %v1671_v0, %v261_v24  ;;  %v528_v21 = vld [vmem:[%s2963_s2 + $0x788] sm:$0xff]  ;;  %v529_v23 = vld [vmem:[%s2963_s2 + $0x790] sm:$0xff]  ;;  %v274_v28 = vld [vmem:[#allocation3 + $0x798] sm:$0xff] }
  0xc8   :  { %v1032_v42 = vmul.f32 %v1673_v1, %v517_v25  ;;  %1539 = vst [vmem:[#allocation6 + $0x708] sm:$0xff] %v1283_v33  ;;  %1540 = vst [vmem:[#allocation6 + $0x710] sm:$0xff] %v1284_v34  ;;  %v1286_v46 = vadd.f32 %v1030_v35, %v772_v29  ;;  %v775_v47 = vmul.f32 %v1671_v0, %v262_v30  ;;  %v530_v29 = vld [vmem:[%s2963_s2 + $0x798] sm:$0xff]  ;;  %v275_v30 = vld [vmem:[#allocation3 + $0x7a0] sm:$0xff] }
  0xc9   :  { %v1033_v48 = vmul.f32 %v1673_v1, %v518_v31  ;;  %v776_v49 = vmul.f32 %v1671_v0, %v263_v32  ;;  %1541 = vst [vmem:[#allocation6 + $0x718] sm:$0xff] %v1285_v39  ;;  %v1287_v53 = vadd.f32 %v1031_v40, %v773_v36  ;;  %v1034_v55 = vmul.f32 %v1673_v1, %v519_v37  ;;  %v531_v35 = vld [vmem:[%s2963_s2 + $0x7a0] sm:$0xff]  ;;  %v276_v36 = vld [vmem:[#allocation3 + $0x7a8] sm:$0xff] }
  0xca   :  { %v1288_v54 = vadd.f32 %v1032_v42, %v774_v41  ;;  %v777_v56 = vmul.f32 %v1671_v0, %v264_v38  ;;  %1542 = vst [vmem:[#allocation6 + $0x720] sm:$0xff] %v1286_v46  ;;  %v1035_v60 = vmul.f32 %v1673_v1, %v520_v43  ;;  %v778_v61 = vmul.f32 %v1671_v0, %v265_v44  ;;  %v532_v41 = vld [vmem:[%s2963_s2 + $0x7a8] sm:$0xff]  ;;  %v277_v42 = vld [vmem:[#allocation3 + $0x7b0] sm:$0xff] }
  0xcb   :  { %v1289_v59 = vadd.f32 %v1033_v48, %v775_v47  ;;  %v1036_v62 = vmul.f32 %v1673_v1, %v521_v45  ;;  %1543 = vst [vmem:[#allocation6 + $0x728] sm:$0xff] %v1287_v53  ;;  %v1290_v4 = vadd.f32 %v1034_v55, %v776_v49  ;;  %v779_v5 = vmul.f32 %v1671_v0, %v266_v50  ;;  %v533_v43 = vld [vmem:[%s2963_s2 + $0x7b0] sm:$0xff]  ;;  %v278_v48 = vld [vmem:[#allocation3 + $0x7b8] sm:$0xff]  ;;  %v279_v50 = vld [vmem:[#allocation3 + $0x7c0] sm:$0xff] }
  0xcc   :  { %1544 = vst [vmem:[#allocation6 + $0x730] sm:$0xff] %v1288_v54  ;;  %v1037_v6 = vmul.f32 %v1673_v1, %v522_v51  ;;  %v780_v7 = vmul.f32 %v1671_v0, %v267_v52  ;;  %v1291_v11 = vadd.f32 %v1035_v60, %v777_v56  ;;  %v1038_v13 = vmul.f32 %v1673_v1, %v523_v57  ;;  %v534_v49 = vld [vmem:[%s2963_s2 + $0x7b8] sm:$0xff]  ;;  %v535_v55 = vld [vmem:[%s2963_s2 + $0x7c0] sm:$0xff]  ;;  %v280_v56 = vld [vmem:[#allocation3 + $0x7c8] sm:$0xff] }
  0xcd   :  { %1545 = vst [vmem:[#allocation6 + $0x738] sm:$0xff] %v1289_v59  ;;  %v1292_v12 = vadd.f32 %v1036_v62, %v778_v61  ;;  %v781_v14 = vmul.f32 %v1671_v0, %v268_v58  ;;  %1546 = vst [vmem:[#allocation6 + $0x740] sm:$0xff] %v1290_v4  ;;  %v1039_v18 = vmul.f32 %v1673_v1, %v524_v63  ;;  %v536_v61 = vld [vmem:[%s2963_s2 + $0x7c8] sm:$0xff]  ;;  %v281_v62 = vld [vmem:[#allocation3 + $0x7d0] sm:$0xff] }
  0xce   :  { %v1293_v17 = vadd.f32 %v1037_v6, %v779_v5  ;;  %v782_v19 = vmul.f32 %v1671_v0, %v269_v2  ;;  %v1040_v20 = vmul.f32 %v1673_v1, %v525_v3  ;;  %1547 = vst [vmem:[#allocation6 + $0x748] sm:$0xff] %v1291_v11  ;;  %v1294_v24 = vadd.f32 %v1038_v13, %v780_v7  ;;  %v537_v63 = vld [vmem:[%s2963_s2 + $0x7d0] sm:$0xff]  ;;  %v282_v6 = vld [vmem:[#allocation3 + $0x7d8] sm:$0xff]  ;;  %v539_v13 = vld [vmem:[%s2963_s2 + $0x7e0] sm:$0xff] }
  0xcf   :  { %1548 = vst [vmem:[#allocation6 + $0x750] sm:$0xff] %v1292_v12  ;;  %v783_v25 = vmul.f32 %v1671_v0, %v270_v8  ;;  %v1041_v26 = vmul.f32 %v1673_v1, %v526_v9  ;;  %v784_v27 = vmul.f32 %v1671_v0, %v271_v10  ;;  %v1295_v31 = vadd.f32 %v1039_v18, %v781_v14  ;;  %v538_v7 = vld [vmem:[%s2963_s2 + $0x7d8] sm:$0xff]  ;;  %v283_v8 = vld [vmem:[#allocation3 + $0x7e0] sm:$0xff]  ;;  %v284_v14 = vld [vmem:[#allocation3 + $0x7e8] sm:$0xff] }
  0xd0   :  { %1549 = vst [vmem:[#allocation6 + $0x758] sm:$0xff] %v1293_v17  ;;  %v1296_v32 = vadd.f32 %v1040_v20, %v782_v19  ;;  %v1042_v33 = vmul.f32 %v1673_v1, %v527_v15  ;;  %v785_v34 = vmul.f32 %v1671_v0, %v272_v16  ;;  %1550 = vst [vmem:[#allocation6 + $0x760] sm:$0xff] %v1294_v24  ;;  %v540_v19 = vld [vmem:[%s2963_s2 + $0x7e8] sm:$0xff]  ;;  %v285_v20 = vld [vmem:[#allocation3 + $0x7f0] sm:$0xff] }
  0xd1   :  { %v1297_v37 = vadd.f32 %v1041_v26, %v783_v25  ;;  %v1043_v38 = vmul.f32 %v1673_v1, %v528_v21  ;;  %v786_v39 = vmul.f32 %v1671_v0, %v273_v22  ;;  %v1044_v40 = vmul.f32 %v1673_v1, %v529_v23  ;;  %1551 = vst [vmem:[#allocation6 + $0x768] sm:$0xff] %v1295_v31  ;;  %v541_v21 = vld [vmem:[%s2963_s2 + $0x7f0] sm:$0xff]  ;;  %v286_v26 = vld [vmem:[#allocation3 + $0x7f8] sm:$0xff] }
  0xd2   :  { %1552 = vst [vmem:[#allocation6 + $0x770] sm:$0xff] %v1296_v32  ;;  %v1298_v44 = vadd.f32 %v1042_v33, %v784_v27  ;;  %v787_v45 = vmul.f32 %v1671_v0, %v274_v28  ;;  %v1045_v46 = vmul.f32 %v1673_v1, %v530_v29  ;;  %v788_v47 = vmul.f32 %v1671_v0, %v275_v30  ;;  %v542_v27 = vld [vmem:[%s2963_s2 + $0x7f8] sm:$0xff]  ;;  %s1611_s2 = scalar_lea.vmem %s1576_s24, 32768 }
  0xd3   :  { %1553 = vst [vmem:[#allocation6 + $0x778] sm:$0xff] %v1297_v37  ;;  %v1299_v51 = vadd.f32 %v1043_v38, %v785_v34  ;;  %v1300_v52 = vadd.f32 %v1044_v40, %v786_v39  ;;  %v1046_v53 = vmul.f32 %v1673_v1, %v531_v35  ;;  %v789_v54 = vmul.f32 %v1671_v0, %v276_v36  ;;  %p1612_p5 = scmp.ne.s32.totalorder %s1576_s24, %s1611_s2  ;;  %p1617_p7 = scmp.lt.s32.totalorder %s1611_s2, %s1611_s2 }
  0xd4   :  { %1554 = vst [vmem:[#allocation6 + $0x780] sm:$0xff] %v1298_v44  ;;  %v1301_v57 = vadd.f32 %v1045_v46, %v787_v45  ;;  %v1047_v58 = vmul.f32 %v1673_v1, %v532_v41  ;;  %v790_v59 = vmul.f32 %v1671_v0, %v277_v42  ;;  %v1048_v60 = vmul.f32 %v1673_v1, %v533_v43 }
  0xd5   :  { %1555 = vst [vmem:[#allocation6 + $0x788] sm:$0xff] %v1299_v51  ;;  %1556 = vst [vmem:[#allocation6 + $0x790] sm:$0xff] %v1300_v52  ;;  %v1302_v2 = vadd.f32 %v1046_v53, %v788_v47  ;;  %v791_v3 = vmul.f32 %v1671_v0, %v278_v48  ;;  %v1049_v4 = vmul.f32 %v1673_v1, %v534_v49  ;;  %p1618_p8 = por %p1617_p7, %p1616_p6 }
  0xd6   :  { %v792_v5 = vmul.f32 %v1671_v0, %v279_v50  ;;  %1557 = vst [vmem:[#allocation6 + $0x798] sm:$0xff] %v1301_v57  ;;  %v1303_v9 = vadd.f32 %v1047_v58, %v789_v54  ;;  %v1304_v10 = vadd.f32 %v1048_v60, %v790_v59  ;;  %v1050_v11 = vmul.f32 %v1673_v1, %v535_v55 }
  0xd7   :  { %v793_v12 = vmul.f32 %v1671_v0, %v280_v56  ;;  %1558 = vst [vmem:[#allocation6 + $0x7a0] sm:$0xff] %v1302_v2  ;;  %v1305_v15 = vadd.f32 %v1049_v4, %v791_v3  ;;  %v1051_v16 = vmul.f32 %v1673_v1, %v536_v61  ;;  %v794_v17 = vmul.f32 %v1671_v0, %v281_v62  ;;  %p1619_p9 = pnand %p1618_p8, %p1612_p5 }
  0xd8   :  { %v1052_v18 = vmul.f32 %v1673_v1, %v537_v63  ;;  %1559 = vst [vmem:[#allocation6 + $0x7a8] sm:$0xff] %v1303_v9  ;;  %1560 = vst [vmem:[#allocation6 + $0x7b0] sm:$0xff] %v1304_v10  ;;  %v1306_v22 = vadd.f32 %v1050_v11, %v792_v5  ;;  %v795_v23 = vmul.f32 %v1671_v0, %v282_v6 }
  0xd9   :  { %v1053_v24 = vmul.f32 %v1673_v1, %v538_v7  ;;  %v796_v25 = vmul.f32 %v1671_v0, %v283_v8  ;;  %1561 = vst [vmem:[#allocation6 + $0x7b8] sm:$0xff] %v1305_v15  ;;  %v1307_v28 = vadd.f32 %v1051_v16, %v793_v12  ;;  %v1054_v30 = vmul.f32 %v1673_v1, %v539_v13 }
  0xda   :  { %v1308_v29 = vadd.f32 %v1052_v18, %v794_v17  ;;  %v797_v31 = vmul.f32 %v1671_v0, %v284_v14  ;;  %1562 = vst [vmem:[#allocation6 + $0x7c0] sm:$0xff] %v1306_v22  ;;  %v1055_v33 = vmul.f32 %v1673_v1, %v540_v19  ;;  %v798_v34 = vmul.f32 %v1671_v0, %v285_v20 }
  0xdb   :  { %v1309_v32 = vadd.f32 %v1053_v24, %v795_v23  ;;  %v1056_v35 = vmul.f32 %v1673_v1, %v541_v21  ;;  %1563 = vst [vmem:[#allocation6 + $0x7c8] sm:$0xff] %v1307_v28  ;;  %v1310_v36 = vadd.f32 %v1054_v30, %v796_v25  ;;  %v799_v37 = vmul.f32 %v1671_v0, %v286_v26 }
  0xdc   :  { %1564 = vst [vmem:[#allocation6 + $0x7d0] sm:$0xff] %v1308_v29  ;;  %v1057_v38 = vmul.f32 %v1673_v1, %v542_v27  ;;  %v1311_v39 = vadd.f32 %v1055_v33, %v797_v31 }
  0xdd   :  { %1565 = vst [vmem:[#allocation6 + $0x7d8] sm:$0xff] %v1309_v32  ;;  %v1312_v40 = vadd.f32 %v1056_v35, %v798_v34  ;;  %1566 = vst [vmem:[#allocation6 + $0x7e0] sm:$0xff] %v1310_v36 }
  0xde   :  { %v1313_v41 = vadd.f32 %v1057_v38, %v799_v37  ;;  %1567 = vst [vmem:[#allocation6 + $0x7e8] sm:$0xff] %v1311_v39 }
  0xdf   :  { %1568 = vst [vmem:[#allocation6 + $0x7f0] sm:$0xff] %v1312_v40 }
  0xe0   :  { %1569 = vst [vmem:[#allocation6 + $0x7f8] sm:$0xff] %v1313_v41 }
  0xe1   :  { %1622 = shalt.err (!%p1619_p9)
}
  0xe2   :  { %1581 = dma.vmem_to_hbm [thread:$0]  %s1576_s24, 32768, %s2964_s3, [#allocation5], %s1636_s15, %s1636_s15, %s1637_s16  }
  0xe3   :  { %1633 = dma.done.wait [#allocation5], 32768  }
  0xe4   :  { %1634 = vsyncadd [#allocation5], 4294934528 }
  0xe5   :  { %1585 = vsyncpa [#allocation4], 1 }
  0xe6   :  { %1586 = vsyncpa [#allocation5], 1 }

</bundles_post_ra>
